<compile_context>
chip_gen: v7x
topology: tpu7x:2x2x1
jax: 0.10.0
libtpu: 0.0.40
codegen_flags: <defaults>
</compile_context>

<pallas_src>
import numpy as np
import jax
import jax.numpy as jnp
from jax import lax
from jax.experimental import pallas as pl
from jax.experimental.pallas import tpu as pltpu

BOARD = 11            # board_sz
C_IN = 2              # input planes
C1, C2 = 32, 64       # conv channels
H1 = BOARD - 2        # 9   (after conv1, valid 3x3)
H2 = H1 - 2           # 7   (after conv2, valid 3x3)
P1 = H1 * H1          # 81
P2 = H2 * H2          # 49
FLAT = C2 * P2        # 3136
HID = 256
NPOS = BOARD * BOARD  # 121
HEAD_PAD = 128        # 121 policy cols + 1 value col + 6 zero pad (lane-dense)
FRAME = 128           # padded 11*11=121 board frame on lanes

SHIFTS = (0, 1, 2, 11, 12, 13, 22, 23, 24)   # dy*11 + dx for the 9 conv taps


# ----------------------------------------------------------------------------
# Fused kernel
# ----------------------------------------------------------------------------
def fused_kernel(x_ref, w1_ref, b1_ref, w2_ref, b2_ref, csel_ref,
                 wf_hbm_ref, bf_ref, wh_ref, bh_ref,
                 out_ref,
                 buf8_ref, wf_vmem_ref, wf_sem):
    # Stream the big fc1 weight (bf16, ~1.6 MB) HBM -> VMEM under everything.
    wf_copy = pltpu.make_async_copy(wf_hbm_ref, wf_vmem_ref, wf_sem)
    wf_copy.start()

    # ---- conv1: im2col via 9 static lane shifts + ONE channel-mix matmul -----
    x = x_ref[...]                                                # (8,128) f32
    x_pad = jnp.concatenate([x, jnp.zeros_like(x)], axis=1)       # (8,256)
    xcol = jnp.concatenate([x_pad[:, s:s + FRAME] for s in SHIFTS], axis=0)  # (72,128)
    s1 = jnp.dot(w1_ref[...], xcol.astype(jnp.bfloat16),
                 preferred_element_type=jnp.float32)              # (32,128)
    s1 = jnp.maximum(s1 + b1_ref[...], 0.0)

    # ---- conv2 (col matrix built in bf16 to keep vreg pressure low) ----------
    s1_bf = s1.astype(jnp.bfloat16)
    s1_pad = jnp.concatenate([s1_bf, jnp.zeros_like(s1_bf)], axis=1)         # (32,256)
    s1col = jnp.concatenate([s1_pad[:, s:s + FRAME] for s in SHIFTS], axis=0)  # (288,128)
    s2 = jnp.dot(w2_ref[...], s1col, preferred_element_type=jnp.float32)     # (64,128)
    s2 = jnp.maximum(s2 + b2_ref[...], 0.0)

    # ---- compact the 11x11 frame to the 49 valid 7x7 positions (one matmul) --
    s2c = jnp.dot(s2.astype(jnp.bfloat16), csel_ref[...],
                  preferred_element_type=jnp.float32)             # (64,49)

    # ---- two-stage sublane->lane fold (replaces the old 64-store flatten) ----
    # stage 1: 8 stores of 8-channel slabs into an (8,392) scratch
    for g in range(8):
        buf8_ref[:, pl.ds(g * P2, P2)] = s2c[g * 8:(g + 1) * 8, :]
    # stage 2: 8 single-row loads + lane concat -> (1,3136) bf16 fc1 input
    rows = [buf8_ref[pl.ds(r, 1), :].astype(jnp.bfloat16) for r in range(8)]
    flat = jnp.concatenate(rows, axis=1)                          # (1,3136)

    # ---- fc1 (wait for the streamed weight only now) --------------------------
    wf_copy.wait()
    h = jnp.dot(flat, wf_vmem_ref[...], preferred_element_type=jnp.float32)  # (1,256)
    h = jnp.maximum(h + bf_ref[...], 0.0)

    # ---- fused lane-dense head: [softmax(policy) | tanh(value) | 0 pad] -------
    head = jnp.dot(h.astype(jnp.bfloat16), wh_ref[...],
                   preferred_element_type=jnp.float32) + bh_ref[...]          # (1,128)
    col = lax.broadcasted_iota(jnp.int32, (1, HEAD_PAD), 1)
    is_pol = col < NPOS
    masked = jnp.where(is_pol, head, jnp.float32(-1e30))
    m = jnp.max(masked, axis=1, keepdims=True)
    e = jnp.exp(masked - m)                       # 0 at non-policy lanes
    denom = jnp.sum(e, axis=1, keepdims=True)
    # NOTE: approx reciprocal -> policy sums to 1 within ~1e-3 relative.
    probs = e * pl.reciprocal(denom, approx=True)
    vpart = jnp.where(col == NPOS, jnp.tanh(head), 0.0)
    out_ref[...] = probs + vpart                  # single unmasked (1,128) store


# ----------------------------------------------------------------------------
# Host-side constants & one-time parameter re-layout (done OUTSIDE the jit)
# ----------------------------------------------------------------------------
_VMEM = pl.BlockSpec(memory_space=pltpu.MemorySpace.VMEM)
_HBM = pl.BlockSpec(memory_space=pl.ANY)
_COST = pl.CostEstimate(flops=7_800_000, transcendentals=130,
                        bytes_accessed=1_750_000)


def _build_csel():
    """(128,49) selector: frame lane py*11+px -> torch 7x7 position py*7+px."""
    csel = np.zeros((FRAME, P2), np.float32)
    for py in range(H2):
        for px in range(H2):
            csel[py * BOARD + px, py * H2 + px] = 1.0
    return csel


def prepare_params(params):
    """One-time weight re-layouts + bf16 casts (matmul operands only)."""
    (c1w, c1b, c2w, c2b, f1w, f1b, pw, pb, vw, vb) = params
    # conv1: (32,2,3,3) -> (32,72); column = tap*8 + in_ch (in_ch>=2 zero-padded
    # so the xcol sublane concat stays vreg-aligned).
    w1t = jnp.transpose(c1w, (0, 2, 3, 1)).reshape(C1, 9, C_IN)
    w1col = jnp.zeros((C1, 9, 8), jnp.float32).at[:, :, :C_IN].set(w1t)
    w1col = w1col.reshape(C1, 72).astype(jnp.bfloat16)
    # conv2: (64,32,3,3) -> (64,288); column = tap*32 + in_ch.
    w2col = jnp.transpose(c2w, (0, 2, 3, 1)).reshape(C2, 9 * C1).astype(jnp.bfloat16)
    b1 = c1b.reshape(C1, 1)                      # f32, broadcast over lanes
    b2 = c2b.reshape(C2, 1)
    csel = jnp.asarray(_build_csel(), jnp.bfloat16)
    # fc1: torch flat index is c*49+p; the kernel emits flat index
    # r*392 + g*49 + p with channel c = 8*g + r  ->  permute rows to match.
    wf3 = f1w.reshape(HID, 8, 8, P2)                                  # (j,g,r,p)
    wf = jnp.transpose(wf3, (2, 1, 3, 0)).reshape(FLAT, HID).astype(jnp.bfloat16)
    bf = f1b.reshape(1, HID)
    # merged policy+value head, lane-padded to 128.
    wh = jnp.concatenate(
        [jnp.transpose(pw), jnp.transpose(vw),
         jnp.zeros((HID, HEAD_PAD - NPOS - 1), jnp.float32)], axis=1).astype(jnp.bfloat16)
    bh = jnp.concatenate(
        [pb, vb, jnp.zeros((HEAD_PAD - NPOS - 1,), jnp.float32)]).reshape(1, HEAD_PAD)
    return (w1col, b1, w2col, b2, csel, wf, bf, wh, bh)


# ----------------------------------------------------------------------------
# Forward wrapper (single fused pallas_call; batch is fixed to 1 by the module)
# ----------------------------------------------------------------------------
def pallas_forward(x_nchw, prep):
    (w1, b1, w2, b2, csel, wf, bf, wh, bh) = prep
    x2d = x_nchw.reshape(C_IN, NPOS)                         # NCHW (1,2,11,11) -> (2,121)
    x_frame = jnp.zeros((8, FRAME), jnp.float32).at[:C_IN, :NPOS].set(x2d)
    out = pl.pallas_call(
        fused_kernel,
        out_shape=jax.ShapeDtypeStruct((1, HEAD_PAD), jnp.float32),
        in_specs=[_VMEM,                               # x frame
                  _VMEM, _VMEM,                        # w1col, b1
                  _VMEM, _VMEM,                        # w2col, b2
                  _VMEM,                               # csel
                  _HBM,                                # wf stays in HBM, manual DMA
                  _VMEM, _VMEM, _VMEM],                # bf, wh, bh
        out_specs=_VMEM,
        scratch_shapes=[pltpu.VMEM((8, 8 * P2), jnp.float32),    # fold buffer (8,392)
                        pltpu.VMEM((FLAT, HID), jnp.bfloat16),   # fc1 weight landing buffer
                        pltpu.SemaphoreType.DMA],
        cost_estimate=_COST,
    )(x_frame, w1, b1, w2, b2, csel, wf, bf, wh, bh)
    return out[0, :NPOS], out[0, NPOS]


# ----------------------------------------------------------------------------
# Deterministic parameter init (PyTorch-style uniform(-1/sqrt(fan_in), ...))
# ----------------------------------------------------------------------------
def init_params(key):
    def u(k, shape, fan_in):
        b = 1.0 / np.sqrt(fan_in)
        return jax.random.uniform(k, shape, jnp.float32, -b, b)

    ks = jax.random.split(key, 10)
    return (
        u(ks[0], (C1, C_IN, 3, 3), C_IN * 9), u(ks[1], (C1,), C_IN * 9),
        u(ks[2], (C2, C1, 3, 3), C1 * 9),     u(ks[3], (C2,), C1 * 9),
        u(ks[4], (HID, FLAT), FLAT),          u(ks[5], (HID,), FLAT),
        u(ks[6], (NPOS, HID), HID),           u(ks[7], (NPOS,), HID),
        u(ks[8], (1, HID), HID),              u(ks[9], (1,), HID),
    )


# ----------------------------------------------------------------------------
# Pure-JAX f32 reference (mirrors the PyTorch forward exactly)
# ----------------------------------------------------------------------------
def reference_forward(x, params):
    (c1w, c1b, c2w, c2b, f1w, f1b, pw, pb, vw, vb) = params
    dn = ('NCHW', 'OIHW', 'NCHW')
    s = lax.conv_general_dilated(x, c1w, (1, 1), 'VALID', dimension_numbers=dn)
    s = jax.nn.relu(s + c1b[None, :, None, None])
    s = lax.conv_general_dilated(s, c2w, (1, 1), 'VALID', dimension_numbers=dn)
    s = jax.nn.relu(s + c2b[None, :, None, None])
    s = s.reshape(1, FLAT)
    s = jax.nn.relu(s @ f1w.T + f1b)
    pi = jax.nn.softmax(s @ pw.T + pb, axis=1)
    v = jnp.tanh(s @ vw.T + vb)
    return pi.reshape(-1), v[0, 0]


if __name__ == "__main__":
    key = jax.random.PRNGKey(0)
    k_param, k_x = jax.random.split(key)
    params = init_params(k_param)
    prep = prepare_params(params)          # one-time weight re-layout / bf16 cast

    # standardState: (1, 2, 11, 11) board planes (NCHW, float32)
    x = jax.random.uniform(k_x, (1, C_IN, BOARD, BOARD), jnp.float32)

    fwd = jax.jit(pallas_forward)
    pi, v = fwd(x, prep)
    jax.block_until_ready((pi, v))

    pi_ref, v_ref = reference_forward(x, params)
    assert pi.shape == (NPOS,)
    # bf16 matmul operands -> loosened tolerances vs. the f32 reference.
    np.testing.assert_allclose(np.asarray(pi), np.asarray(pi_ref), atol=2e-3, rtol=1e-2)
    np.testing.assert_allclose(float(v), float(v_ref), atol=1e-2, rtol=1e-2)

    print("KERNEL_OK")
</pallas_src>

<mosaic_0001>
module attributes {stable_mosaic.version = 11 : i64} {
  func.func @fused_kernel(%arg0: memref<8x128xf32, #tpu.memory_space<vmem>>, %arg1: memref<32x72xbf16, #tpu.memory_space<vmem>>, %arg2: memref<32x1xf32, #tpu.memory_space<vmem>>, %arg3: memref<64x288xbf16, #tpu.memory_space<vmem>>, %arg4: memref<64x1xf32, #tpu.memory_space<vmem>>, %arg5: memref<128x49xbf16, #tpu.memory_space<vmem>>, %arg6: memref<3136x256xbf16, #tpu.memory_space<any>>, %arg7: memref<1x256xf32, #tpu.memory_space<vmem>>, %arg8: memref<256x128xbf16, #tpu.memory_space<vmem>>, %arg9: memref<1x128xf32, #tpu.memory_space<vmem>>, %arg10: memref<1x128xf32, #tpu.memory_space<vmem>>, %arg11: memref<8x392xf32, #tpu.memory_space<vmem>>, %arg12: memref<3136x256xbf16, #tpu.memory_space<vmem>>, %arg13: memref<!tpu.dma_semaphore, #tpu.memory_space<semaphore_mem>>) attributes {dimension_semantics = [], scalar_prefetch = 0 : i64, scratch_operands = 3 : i64, tpu.core_type = #tpu.core_type<tc>} {
    tpu.enqueue_dma source(%arg6 : memref<3136x256xbf16, #tpu.memory_space<any>>) target(%arg12 : memref<3136x256xbf16, #tpu.memory_space<vmem>>) target_semaphore(%arg13 : memref<!tpu.dma_semaphore, #tpu.memory_space<semaphore_mem>>)
    %c0 = arith.constant 0 : index
    %c0_0 = arith.constant 0 : index
    %0 = vector.load %arg0[%c0, %c0_0] : memref<8x128xf32, #tpu.memory_space<vmem>>, vector<8x128xf32>
    %cst = arith.constant 0.000000e+00 : f32
    %1 = vector.broadcast %cst : f32 to vector<8x128xf32>
    %2 = tpu.concatenate %0, %1 in 1 : vector<8x128xf32>, vector<8x128xf32> -> vector<8x256xf32>
    %3 = vector.extract_strided_slice %2 {offsets = [0, 0], sizes = [8, 128], strides = [1, 1]} : vector<8x256xf32> to vector<8x128xf32>
    %4 = vector.extract_strided_slice %2 {offsets = [0, 1], sizes = [8, 128], strides = [1, 1]} : vector<8x256xf32> to vector<8x128xf32>
    %5 = vector.extract_strided_slice %2 {offsets = [0, 2], sizes = [8, 128], strides = [1, 1]} : vector<8x256xf32> to vector<8x128xf32>
    %6 = vector.extract_strided_slice %2 {offsets = [0, 11], sizes = [8, 128], strides = [1, 1]} : vector<8x256xf32> to vector<8x128xf32>
    %7 = vector.extract_strided_slice %2 {offsets = [0, 12], sizes = [8, 128], strides = [1, 1]} : vector<8x256xf32> to vector<8x128xf32>
    %8 = vector.extract_strided_slice %2 {offsets = [0, 13], sizes = [8, 128], strides = [1, 1]} : vector<8x256xf32> to vector<8x128xf32>
    %9 = vector.extract_strided_slice %2 {offsets = [0, 22], sizes = [8, 128], strides = [1, 1]} : vector<8x256xf32> to vector<8x128xf32>
    %10 = vector.extract_strided_slice %2 {offsets = [0, 23], sizes = [8, 128], strides = [1, 1]} : vector<8x256xf32> to vector<8x128xf32>
    %11 = vector.extract_strided_slice %2 {offsets = [0, 24], sizes = [8, 128], strides = [1, 1]} : vector<8x256xf32> to vector<8x128xf32>
    %12 = tpu.concatenate %3, %4, %5, %6, %7, %8, %9, %10, %11 in 0 : vector<8x128xf32>, vector<8x128xf32>, vector<8x128xf32>, vector<8x128xf32>, vector<8x128xf32>, vector<8x128xf32>, vector<8x128xf32>, vector<8x128xf32>, vector<8x128xf32> -> vector<72x128xf32>
    %c0_1 = arith.constant 0 : index
    %c0_2 = arith.constant 0 : index
    %13 = vector.load %arg1[%c0_1, %c0_2] : memref<32x72xbf16, #tpu.memory_space<vmem>>, vector<32x72xbf16>
    %14 = arith.truncf %12 : vector<72x128xf32> to vector<72x128xbf16>
    %cst_3 = arith.constant dense<0.000000e+00> : vector<32x128xf32>
    %15 = tpu.matmul %13, %14, %cst_3 {dimension_numbers = #tpu.dot_dimension_numbers<[1], [0], [0], [1], [0, 0, 1, 1], [], []>} : vector<32x72xbf16>, vector<72x128xbf16>, vector<32x128xf32> -> vector<32x128xf32>
    %c0_4 = arith.constant 0 : index
    %c0_5 = arith.constant 0 : index
    %16 = vector.load %arg2[%c0_4, %c0_5] : memref<32x1xf32, #tpu.memory_space<vmem>>, vector<32x1xf32>
    %17 = vector.broadcast %16 : vector<32x1xf32> to vector<32x128xf32>
    %18 = arith.addf %15, %17 : vector<32x128xf32>
    %cst_6 = arith.constant 0.000000e+00 : f32
    %19 = vector.broadcast %cst_6 : f32 to vector<32x128xf32>
    %20 = arith.maximumf %18, %19 : vector<32x128xf32>
    %21 = arith.truncf %20 : vector<32x128xf32> to vector<32x128xbf16>
    %cst_7 = arith.constant 0.000000e+00 : bf16
    %22 = vector.broadcast %cst_7 : bf16 to vector<32x128xbf16>
    %23 = tpu.concatenate %21, %22 in 1 : vector<32x128xbf16>, vector<32x128xbf16> -> vector<32x256xbf16>
    %24 = vector.extract_strided_slice %23 {offsets = [0, 0], sizes = [32, 128], strides = [1, 1]} : vector<32x256xbf16> to vector<32x128xbf16>
    %25 = vector.extract_strided_slice %23 {offsets = [0, 1], sizes = [32, 128], strides = [1, 1]} : vector<32x256xbf16> to vector<32x128xbf16>
    %26 = vector.extract_strided_slice %23 {offsets = [0, 2], sizes = [32, 128], strides = [1, 1]} : vector<32x256xbf16> to vector<32x128xbf16>
    %27 = vector.extract_strided_slice %23 {offsets = [0, 11], sizes = [32, 128], strides = [1, 1]} : vector<32x256xbf16> to vector<32x128xbf16>
    %28 = vector.extract_strided_slice %23 {offsets = [0, 12], sizes = [32, 128], strides = [1, 1]} : vector<32x256xbf16> to vector<32x128xbf16>
    %29 = vector.extract_strided_slice %23 {offsets = [0, 13], sizes = [32, 128], strides = [1, 1]} : vector<32x256xbf16> to vector<32x128xbf16>
    %30 = vector.extract_strided_slice %23 {offsets = [0, 22], sizes = [32, 128], strides = [1, 1]} : vector<32x256xbf16> to vector<32x128xbf16>
    %31 = vector.extract_strided_slice %23 {offsets = [0, 23], sizes = [32, 128], strides = [1, 1]} : vector<32x256xbf16> to vector<32x128xbf16>
    %32 = vector.extract_strided_slice %23 {offsets = [0, 24], sizes = [32, 128], strides = [1, 1]} : vector<32x256xbf16> to vector<32x128xbf16>
    %33 = tpu.concatenate %24, %25, %26, %27, %28, %29, %30, %31, %32 in 0 : vector<32x128xbf16>, vector<32x128xbf16>, vector<32x128xbf16>, vector<32x128xbf16>, vector<32x128xbf16>, vector<32x128xbf16>, vector<32x128xbf16>, vector<32x128xbf16>, vector<32x128xbf16> -> vector<288x128xbf16>
    %c0_8 = arith.constant 0 : index
    %c0_9 = arith.constant 0 : index
    %34 = vector.load %arg3[%c0_8, %c0_9] : memref<64x288xbf16, #tpu.memory_space<vmem>>, vector<64x288xbf16>
    %cst_10 = arith.constant dense<0.000000e+00> : vector<64x128xf32>
    %35 = tpu.matmul %34, %33, %cst_10 {dimension_numbers = #tpu.dot_dimension_numbers<[1], [0], [0], [1], [0, 0, 1, 1], [], []>} : vector<64x288xbf16>, vector<288x128xbf16>, vector<64x128xf32> -> vector<64x128xf32>
    %c0_11 = arith.constant 0 : index
    %c0_12 = arith.constant 0 : index
    %36 = vector.load %arg4[%c0_11, %c0_12] : memref<64x1xf32, #tpu.memory_space<vmem>>, vector<64x1xf32>
    %37 = vector.broadcast %36 : vector<64x1xf32> to vector<64x128xf32>
    %38 = arith.addf %35, %37 : vector<64x128xf32>
    %cst_13 = arith.constant 0.000000e+00 : f32
    %39 = vector.broadcast %cst_13 : f32 to vector<64x128xf32>
    %40 = arith.maximumf %38, %39 : vector<64x128xf32>
    %41 = arith.truncf %40 : vector<64x128xf32> to vector<64x128xbf16>
    %c0_14 = arith.constant 0 : index
    %c0_15 = arith.constant 0 : index
    %42 = vector.load %arg5[%c0_14, %c0_15] : memref<128x49xbf16, #tpu.memory_space<vmem>>, vector<128x49xbf16>
    %cst_16 = arith.constant dense<0.000000e+00> : vector<64x49xf32>
    %43 = tpu.matmul %41, %42, %cst_16 {dimension_numbers = #tpu.dot_dimension_numbers<[1], [0], [0], [1], [0, 0, 1, 1], [], []>} : vector<64x128xbf16>, vector<128x49xbf16>, vector<64x49xf32> -> vector<64x49xf32>
    %44 = vector.extract_strided_slice %43 {offsets = [0, 0], sizes = [8, 49], strides = [1, 1]} : vector<64x49xf32> to vector<8x49xf32>
    %c0_17 = arith.constant 0 : index
    %c0_18 = arith.constant 0 : index
    %45 = vector.load %arg11[%c0_17, %c0_18] : memref<8x392xf32, #tpu.memory_space<vmem>>, vector<8x49xf32>
    tpu.vector_store %arg11[%c0_17, %c0_18], %44 {strides = array<i32>} : memref<8x392xf32, #tpu.memory_space<vmem>>, vector<8x49xf32>,
    %46 = vector.extract_strided_slice %43 {offsets = [8, 0], sizes = [8, 49], strides = [1, 1]} : vector<64x49xf32> to vector<8x49xf32>
    %c0_19 = arith.constant 0 : index
    %c49 = arith.constant 49 : index
    %47 = vector.load %arg11[%c0_19, %c49] : memref<8x392xf32, #tpu.memory_space<vmem>>, vector<8x49xf32>
    tpu.vector_store %arg11[%c0_19, %c49], %46 {strides = array<i32>} : memref<8x392xf32, #tpu.memory_space<vmem>>, vector<8x49xf32>,
    %48 = vector.extract_strided_slice %43 {offsets = [16, 0], sizes = [8, 49], strides = [1, 1]} : vector<64x49xf32> to vector<8x49xf32>
    %c0_20 = arith.constant 0 : index
    %c98 = arith.constant 98 : index
    %49 = vector.load %arg11[%c0_20, %c98] : memref<8x392xf32, #tpu.memory_space<vmem>>, vector<8x49xf32>
    tpu.vector_store %arg11[%c0_20, %c98], %48 {strides = array<i32>} : memref<8x392xf32, #tpu.memory_space<vmem>>, vector<8x49xf32>,
    %50 = vector.extract_strided_slice %43 {offsets = [24, 0], sizes = [8, 49], strides = [1, 1]} : vector<64x49xf32> to vector<8x49xf32>
    %c0_21 = arith.constant 0 : index
    %c147 = arith.constant 147 : index
    %51 = vector.load %arg11[%c0_21, %c147] : memref<8x392xf32, #tpu.memory_space<vmem>>, vector<8x49xf32>
    tpu.vector_store %arg11[%c0_21, %c147], %50 {strides = array<i32>} : memref<8x392xf32, #tpu.memory_space<vmem>>, vector<8x49xf32>,
    %52 = vector.extract_strided_slice %43 {offsets = [32, 0], sizes = [8, 49], strides = [1, 1]} : vector<64x49xf32> to vector<8x49xf32>
    %c0_22 = arith.constant 0 : index
    %c196 = arith.constant 196 : index
    %53 = vector.load %arg11[%c0_22, %c196] : memref<8x392xf32, #tpu.memory_space<vmem>>, vector<8x49xf32>
    tpu.vector_store %arg11[%c0_22, %c196], %52 {strides = array<i32>} : memref<8x392xf32, #tpu.memory_space<vmem>>, vector<8x49xf32>,
    %54 = vector.extract_strided_slice %43 {offsets = [40, 0], sizes = [8, 49], strides = [1, 1]} : vector<64x49xf32> to vector<8x49xf32>
    %c0_23 = arith.constant 0 : index
    %c245 = arith.constant 245 : index
    %55 = vector.load %arg11[%c0_23, %c245] : memref<8x392xf32, #tpu.memory_space<vmem>>, vector<8x49xf32>
    tpu.vector_store %arg11[%c0_23, %c245], %54 {strides = array<i32>} : memref<8x392xf32, #tpu.memory_space<vmem>>, vector<8x49xf32>,
    %56 = vector.extract_strided_slice %43 {offsets = [48, 0], sizes = [8, 49], strides = [1, 1]} : vector<64x49xf32> to vector<8x49xf32>
    %c0_24 = arith.constant 0 : index
    %c294 = arith.constant 294 : index
    %57 = vector.load %arg11[%c0_24, %c294] : memref<8x392xf32, #tpu.memory_space<vmem>>, vector<8x49xf32>
    tpu.vector_store %arg11[%c0_24, %c294], %56 {strides = array<i32>} : memref<8x392xf32, #tpu.memory_space<vmem>>, vector<8x49xf32>,
    %58 = vector.extract_strided_slice %43 {offsets = [56, 0], sizes = [8, 49], strides = [1, 1]} : vector<64x49xf32> to vector<8x49xf32>
    %c0_25 = arith.constant 0 : index
    %c343 = arith.constant 343 : index
    %59 = vector.load %arg11[%c0_25, %c343] : memref<8x392xf32, #tpu.memory_space<vmem>>, vector<8x49xf32>
    tpu.vector_store %arg11[%c0_25, %c343], %58 {strides = array<i32>} : memref<8x392xf32, #tpu.memory_space<vmem>>, vector<8x49xf32>,
    %c0_26 = arith.constant 0 : index
    %c0_27 = arith.constant 0 : index
    %60 = vector.load %arg11[%c0_26, %c0_27] : memref<8x392xf32, #tpu.memory_space<vmem>>, vector<1x392xf32>
    %61 = arith.truncf %60 : vector<1x392xf32> to vector<1x392xbf16>
    %c1 = arith.constant 1 : index
    %c0_28 = arith.constant 0 : index
    %62 = vector.load %arg11[%c1, %c0_28] : memref<8x392xf32, #tpu.memory_space<vmem>>, vector<1x392xf32>
    %63 = arith.truncf %62 : vector<1x392xf32> to vector<1x392xbf16>
    %c2 = arith.constant 2 : index
    %c0_29 = arith.constant 0 : index
    %64 = vector.load %arg11[%c2, %c0_29] : memref<8x392xf32, #tpu.memory_space<vmem>>, vector<1x392xf32>
    %65 = arith.truncf %64 : vector<1x392xf32> to vector<1x392xbf16>
    %c3 = arith.constant 3 : index
    %c0_30 = arith.constant 0 : index
    %66 = vector.load %arg11[%c3, %c0_30] : memref<8x392xf32, #tpu.memory_space<vmem>>, vector<1x392xf32>
    %67 = arith.truncf %66 : vector<1x392xf32> to vector<1x392xbf16>
    %c4 = arith.constant 4 : index
    %c0_31 = arith.constant 0 : index
    %68 = vector.load %arg11[%c4, %c0_31] : memref<8x392xf32, #tpu.memory_space<vmem>>, vector<1x392xf32>
    %69 = arith.truncf %68 : vector<1x392xf32> to vector<1x392xbf16>
    %c5 = arith.constant 5 : index
    %c0_32 = arith.constant 0 : index
    %70 = vector.load %arg11[%c5, %c0_32] : memref<8x392xf32, #tpu.memory_space<vmem>>, vector<1x392xf32>
    %71 = arith.truncf %70 : vector<1x392xf32> to vector<1x392xbf16>
    %c6 = arith.constant 6 : index
    %c0_33 = arith.constant 0 : index
    %72 = vector.load %arg11[%c6, %c0_33] : memref<8x392xf32, #tpu.memory_space<vmem>>, vector<1x392xf32>
    %73 = arith.truncf %72 : vector<1x392xf32> to vector<1x392xbf16>
    %c7 = arith.constant 7 : index
    %c0_34 = arith.constant 0 : index
    %74 = vector.load %arg11[%c7, %c0_34] : memref<8x392xf32, #tpu.memory_space<vmem>>, vector<1x392xf32>
    %75 = arith.truncf %74 : vector<1x392xf32> to vector<1x392xbf16>
    %76 = tpu.concatenate %61, %63, %65, %67, %69, %71, %73, %75 in 1 : vector<1x392xbf16>, vector<1x392xbf16>, vector<1x392xbf16>, vector<1x392xbf16>, vector<1x392xbf16>, vector<1x392xbf16>, vector<1x392xbf16>, vector<1x392xbf16> -> vector<1x3136xbf16>
    tpu.wait_dma2 semaphore(%arg13 : memref<!tpu.dma_semaphore, #tpu.memory_space<semaphore_mem>>) src(%arg6 : memref<3136x256xbf16, #tpu.memory_space<any>>) dst(%arg12 : memref<3136x256xbf16, #tpu.memory_space<vmem>>)
    %c0_35 = arith.constant 0 : index
    %c0_36 = arith.constant 0 : index
    %77 = vector.load %arg12[%c0_35, %c0_36] : memref<3136x256xbf16, #tpu.memory_space<vmem>>, vector<3136x256xbf16>
    %cst_37 = arith.constant dense<0.000000e+00> : vector<1x256xf32>
    %78 = tpu.matmul %76, %77, %cst_37 {dimension_numbers = #tpu.dot_dimension_numbers<[1], [0], [0], [1], [0, 0, 1, 1], [], []>} : vector<1x3136xbf16>, vector<3136x256xbf16>, vector<1x256xf32> -> vector<1x256xf32>
    %c0_38 = arith.constant 0 : index
    %c0_39 = arith.constant 0 : index
    %79 = vector.load %arg7[%c0_38, %c0_39] : memref<1x256xf32, #tpu.memory_space<vmem>>, vector<1x256xf32>
    %80 = arith.addf %78, %79 : vector<1x256xf32>
    %cst_40 = arith.constant 0.000000e+00 : f32
    %81 = vector.broadcast %cst_40 : f32 to vector<1x256xf32>
    %82 = arith.maximumf %80, %81 : vector<1x256xf32>
    %83 = arith.truncf %82 : vector<1x256xf32> to vector<1x256xbf16>
    %c0_41 = arith.constant 0 : index
    %c0_42 = arith.constant 0 : index
    %84 = vector.load %arg8[%c0_41, %c0_42] : memref<256x128xbf16, #tpu.memory_space<vmem>>, vector<256x128xbf16>
    %cst_43 = arith.constant dense<0.000000e+00> : vector<1x128xf32>
    %85 = tpu.matmul %83, %84, %cst_43 {dimension_numbers = #tpu.dot_dimension_numbers<[1], [0], [0], [1], [0, 0, 1, 1], [], []>} : vector<1x256xbf16>, vector<256x128xbf16>, vector<1x128xf32> -> vector<1x128xf32>
    %c0_44 = arith.constant 0 : index
    %c0_45 = arith.constant 0 : index
    %86 = vector.load %arg9[%c0_44, %c0_45] : memref<1x128xf32, #tpu.memory_space<vmem>>, vector<1x128xf32>
    %87 = arith.addf %85, %86 : vector<1x128xf32>
    %88 = tpu.iota {dimensions = array<i32: 1>} : vector<1x128xi32>
    %c121_i32 = arith.constant 121 : i32
    %89 = vector.broadcast %c121_i32 : i32 to vector<1x128xi32>
    %90 = arith.cmpi slt, %88, %89 : vector<1x128xi32>
    %cst_46 = arith.constant -1.000000e+30 : f32
    %91 = vector.broadcast %cst_46 : f32 to vector<1x128xf32>
    %92 = arith.select %90, %87, %91 : vector<1x128xi1>, vector<1x128xf32>
    %cst_47 = arith.constant dense<0xFF800000> : vector<1xf32>
    %93 = vector.multi_reduction <maximumf>, %92, %cst_47 [1] : vector<1x128xf32> to vector<1xf32>
    %94 = vector.shape_cast %93 : vector<1xf32> to vector<1x1xf32>
    %95 = vector.broadcast %94 : vector<1x1xf32> to vector<1x128xf32>
    %96 = arith.subf %92, %95 : vector<1x128xf32>
    %97 = math.exp %96 : vector<1x128xf32>
    %cst_48 = arith.constant dense<0.000000e+00> : vector<1xf32>
    %98 = vector.multi_reduction <add>, %97, %cst_48 [1] : vector<1x128xf32> to vector<1xf32>
    %99 = vector.shape_cast %98 : vector<1xf32> to vector<1x1xf32>
    %100 = tpu.reciprocal %99 {approx = true} : vector<1x1xf32> -> vector<1x1xf32>
    %101 = vector.broadcast %100 : vector<1x1xf32> to vector<1x128xf32>
    %102 = arith.mulf %97, %101 : vector<1x128xf32>
    %c121_i32_49 = arith.constant 121 : i32
    %103 = vector.broadcast %c121_i32_49 : i32 to vector<1x128xi32>
    %104 = arith.cmpi eq, %88, %103 : vector<1x128xi32>
    %105 = math.tanh %87 : vector<1x128xf32>
    %cst_50 = arith.constant 0.000000e+00 : f32
    %106 = vector.broadcast %cst_50 : f32 to vector<1x128xf32>
    %107 = arith.select %104, %105, %106 : vector<1x128xi1>, vector<1x128xf32>
    %108 = arith.addf %102, %107 : vector<1x128xf32>
    %c0_51 = arith.constant 0 : index
    %c0_52 = arith.constant 0 : index
    %109 = vector.load %arg10[%c0_51, %c0_52] : memref<1x128xf32, #tpu.memory_space<vmem>>, vector<1x128xf32>
    tpu.vector_store %arg10[%c0_51, %c0_52], %108 {strides = array<i32>} : memref<1x128xf32, #tpu.memory_space<vmem>>, vector<1x128xf32>,
    return
  }
}

</mosaic_0001>

<bundles_post_ra>
// kernel: pallas_forward.1
= control target key start
LH: loop header
LB: loop body
LE: loop exit
PB: predicated region body
PF: predicated region fallthrough
CT: control target
= control target key end

     0   :  { %15 = vsyncpa [#allocation6], 0  ;;  %s3328_s0 = inlined_call_operand.vmem [shape: f32[8,128], index: 0, kind: input, shape index: {}]   ;;  %s3329_s1 = inlined_call_operand.hbm [shape: bf16[32,72], index: 1, kind: input, shape index: {}]   ;;  %s3330_s2 = inlined_call_operand.vmem [shape: f32[32,1], index: 2, kind: input, shape index: {}]   ;;  %s3331_s3 = inlined_call_operand.hbm [shape: bf16[64,288], index: 3, kind: input, shape index: {}]   ;;  %s3332_s4 = inlined_call_operand.vmem [shape: f32[64,1], index: 4, kind: input, shape index: {}]   ;;  %s3333_s5 = inlined_call_operand.vmem [shape: bf16[128,49], index: 5, kind: input, shape index: {}]   ;;  %s3334_s6 = inlined_call_operand.hbm [shape: bf16[3136,256], index: 6, kind: input, shape index: {}]   ;;  %s3335_s7 = inlined_call_operand.hbm [shape: f32[1,256], index: 7, kind: input, shape index: {}]   ;;  %s3336_s8 = inlined_call_operand.hbm [shape: bf16[256,128], index: 8, kind: input, shape index: {}]   ;;  %s3337_s9 = inlined_call_operand.hbm [shape: f32[1,128], index: 9, kind: input, shape index: {}]   ;;  %s3338_s10 = inlined_call_operand.vmem [shape: f32[1,128], index: 10, kind: output, shape index: {}]  }
   0x1   :  { %16 = vsyncpa [#allocation8], 0 }
   0x2   :  { %17 = vsyncpa [#allocation11], 0  ;;  %s2856_s13 = smov [#allocation7]   ;;  %s2738_s17 = scalar_lea.hbm %s3331_s3, 1536 }
   0x3   :  { %s39_s14 = sshll.u32 %s2856_s13, 4  ;;  %p2739_p0 = scmp.ne.s32.totalorder %s3331_s3, %s2738_s17  ;;  %s40_s14 = int_to_ptr.vmem [resolvable:$true] %s39_s14 }
   0x4   :  { %p2742_p1 = scmp.lt.u32.totalorder %s2738_s17, %s3331_s3 }
   0x6   :  { %p2744_p2 = pnand %p2742_p1, %p2739_p0 }
   0x8   :  { %2747 = shalt.err (!%p2744_p2)
}
   0x9   :  { %s2748_s22 = scalar_lea.vmem %s40_s14, 1536  ;;  %p2753_p4 = scmp.lt.s32.totalorder %s40_s14, %s40_s14 }
   0xa   :  { %p2749_p3 = scmp.ne.s32.totalorder %s40_s14, %s2748_s22  ;;  %p2754_p5 = scmp.lt.s32.totalorder %s2748_s22, %s2748_s22 }
   0xc   :  { %p2755_p6 = por %p2754_p5, %p2753_p4 }
   0xe   :  { %p2756_p7 = pnand %p2755_p6, %p2749_p3 }
  0x10   :  { %2759 = shalt.err (!%p2756_p7)
}
  0x11   :  { %s2857_s23 = smov 192   ;;  %s2858_s24 = smov 12  }
  0x12   :  { %45 = dma.hbm_to_vmem [thread:$0]  %s3331_s3, 1536, %s40_s14, [#allocation8], %s2857_s23, %s2857_s23, %s2858_s24  }
  0x13   :  { %s2859_s27 = smov [#allocation10]   ;;  %s2860_s29 = smov [#allocation5]  }
  0x14   :  { %s65_s28 = sshll.u32 %s2859_s27, 4  ;;  %s25_s30 = sshll.u32 %s2860_s29, 4  ;;  %s66_s28 = int_to_ptr.vmem [resolvable:$true] %s65_s28  ;;  %s26_s30 = int_to_ptr.vmem [resolvable:$true] %s25_s30 }
  0x15   :  { %s2760_s13 = scalar_lea.hbm %s3336_s8, 2048 }
  0x16   :  { %p2761_p8 = scmp.ne.s32.totalorder %s3336_s8, %s2760_s13  ;;  %p2764_p9 = scmp.lt.u32.totalorder %s2760_s13, %s3336_s8 }
  0x18   :  { %p2766_p10 = pnand %p2764_p9, %p2761_p8 }
  0x1a   :  { %2769 = shalt.err (!%p2766_p10)
}
  0x1b   :  { %s2770_s3 = scalar_lea.vmem %s66_s28, 2048  ;;  %p2775_p12 = scmp.lt.s32.totalorder %s66_s28, %s66_s28 }
  0x1c   :  { %p2771_p11 = scmp.ne.s32.totalorder %s66_s28, %s2770_s3  ;;  %p2776_p13 = scmp.lt.s32.totalorder %s2770_s3, %s2770_s3 }
  0x1e   :  { %p2777_p0 = por %p2776_p13, %p2775_p12 }
  0x20   :  { %p2778_p1 = pnand %p2777_p0, %p2771_p11 }
  0x22   :  { %2781 = shalt.err (!%p2778_p1)
}
  0x23   :  { %s2861_s14 = smov 64   ;;  %s2862_s19 = smov 4  }
  0x24   :  { %71 = dma.hbm_to_vmem [thread:$0]  %s3336_s8, 2048, %s66_s28, [#allocation11], %s2861_s14, %s2861_s14, %s2862_s19  }
  0x25   :  { %s2782_s24 = scalar_lea.hbm %s3329_s1, 256 }
  0x26   :  { %p2783_p2 = scmp.ne.s32.totalorder %s3329_s1, %s2782_s24  ;;  %p2786_p3 = scmp.lt.u32.totalorder %s2782_s24, %s3329_s1 }
  0x28   :  { %p2788_p4 = pnand %p2786_p3, %p2783_p2 }
  0x2a   :  { %2791 = shalt.err (!%p2788_p4)
}
  0x2b   :  { %s2792_s11 = scalar_lea.vmem %s26_s30, 256  ;;  %p2797_p6 = scmp.lt.s32.totalorder %s26_s30, %s26_s30 }
  0x2c   :  { %p2793_p5 = scmp.ne.s32.totalorder %s26_s30, %s2792_s11  ;;  %p2798_p7 = scmp.lt.s32.totalorder %s2792_s11, %s2792_s11 }
  0x2e   :  { %p2799_p8 = por %p2798_p7, %p2797_p6 }
  0x30   :  { %p2800_p9 = pnand %p2799_p8, %p2793_p5 }
  0x32   :  { %2803 = shalt.err (!%p2800_p9)
}
  0x33   :  { %31 = dma.hbm_to_vmem [thread:$0]  %s3329_s1, 256, %s26_s30, [#allocation6], %s2861_s14, %s2861_s14, %s2862_s19  }
  0x34   :  { %s2863_s12 = smov [#allocation9]   ;;  %s2864_s15 = smov [#allocation12]  }
  0x35   :  { %s56_s13 = sshll.u32 %s2863_s12, 4  ;;  %s78_s16 = sshll.u32 %s2864_s15, 4  ;;  %s57_s13 = int_to_ptr.vmem [resolvable:$true] %s56_s13  ;;  %s79_s16 = int_to_ptr.vmem [resolvable:$true] %s78_s16 }
  0x36   :  { %s2804_s3 = scalar_lea.hbm %s3335_s7, 32 }
  0x37   :  { %p2805_p10 = scmp.ne.s32.totalorder %s3335_s7, %s2804_s3  ;;  %p2808_p11 = scmp.lt.u32.totalorder %s2804_s3, %s3335_s7 }
  0x39   :  { %p2810_p12 = pnand %p2808_p11, %p2805_p10 }
  0x3b   :  { %2813 = shalt.err (!%p2810_p12)
}
  0x3c   :  { %s2814_s1 = scalar_lea.vmem %s57_s13, 32  ;;  %p2819_p0 = scmp.lt.s32.totalorder %s57_s13, %s57_s13 }
  0x3d   :  { %p2815_p13 = scmp.ne.s32.totalorder %s57_s13, %s2814_s1  ;;  %p2820_p1 = scmp.lt.s32.totalorder %s2814_s1, %s2814_s1 }
  0x3f   :  { %p2821_p2 = por %p2820_p1, %p2819_p0 }
  0x41   :  { %p2822_p3 = pnand %p2821_p2, %p2815_p13 }
  0x43   :  { %2825 = shalt.err (!%p2822_p3)
}
  0x44   :  { %59 = dma.hbm_to_vmem [thread:$0]  %s3335_s7, 32, %s57_s13, [#allocation8]  }
  0x45   :  { %s2826_s27 = scalar_lea.hbm %s3337_s9, 16 }
  0x46   :  { %p2827_p4 = scmp.ne.s32.totalorder %s3337_s9, %s2826_s27  ;;  %p2830_p5 = scmp.lt.u32.totalorder %s2826_s27, %s3337_s9 }
  0x48   :  { %p2832_p6 = pnand %p2830_p5, %p2827_p4 }
  0x4a   :  { %2835 = shalt.err (!%p2832_p6)
}
  0x4b   :  { %s2836_s12 = scalar_lea.vmem %s79_s16, 16  ;;  %s2840_s15 = scalar_lea.vmem %s79_s16, 32 }
  0x4c   :  { %p2837_p7 = scmp.ne.s32.totalorder %s79_s16, %s2836_s12  ;;  %p2841_p8 = scmp.lt.s32.totalorder %s79_s16, %s79_s16 }
  0x4d   :  { %p2842_p9 = scmp.lt.s32.totalorder %s2840_s15, %s2836_s12 }
  0x4f   :  { %p2843_p10 = por %p2842_p9, %p2841_p8 }
  0x51   :  { %p2844_p11 = pnand %p2843_p10, %p2837_p7 }
  0x53   :  { %2847 = shalt.err (!%p2844_p11)
}
  0x54   :  { %81 = dma.hbm_to_vmem [thread:$0]  %s3337_s9, 16, %s79_s16, [#allocation11]  }
  0x55   :  { %2848 = dma.done.wait [#allocation6], 256  }
  0x56   :  { %2849 = vsyncadd [#allocation6], 4294967040 }
  0x57   :  { %2850 = dma.done.wait [#allocation8], 1568  }
  0x58   :  { %2851 = vsyncadd [#allocation8], 4294965728 }
  0x59   :  { %2852 = dma.done.wait [#allocation11], 2064  }
  0x5a   :  { %2853 = vsyncadd [#allocation11], 4294965232  ;;  %s102_s17 = sld [smem:[#allocation0]]   ;;  %s2865_s18 = smov 256   ;;  %v2871_v1 = vmov 0.0   ;;  %vm235_vm0 = vcmask 588800  }
  0x5b   :  { %114 = sst [smem:[#allocation14]] %s2865_s18  ;;  %s2866_s3 = smov 2   ;;  %v2880_v4 = vmov 0   ;;  %vm140_vm1 = vcmask 1039360   ;;  %vm154_vm2 = vcmask 957440   ;;  %vm147_vm3 = vcmask 1031168  }
  0x5c   :  { %116 = sst [smem:[#allocation14 + $0x1]] %s2865_s18  ;;  %s2867_s20 = smov [#allocation3]   ;;  %2689 = vset.pattern.permute.xlu1 %v2880_v4  ;;  %2688 = vset.pattern.permute.xlu0 %v2880_v4  ;;  %vm161_vm4 = vcmask 949248   ;;  %vm168_vm5 = vcmask 941056   ;;  %vm175_vm6 = vcmask 867328   ;;  %vm189_vm7 = vcmask 850944  }
  0x5d   :  { %118 = sst [smem:[#allocation14 + $0x2]] %s2866_s3  ;;  %s110_s21 = sshll.u32 %s2867_s20, 4  ;;  %vm182_vm8 = vcmask 859136   ;;  %vm242_vm9 = vcmask 1043456   ;;  %vm516_vm10 = vcmask 261120   ;;  %vm800_vm11 = vcmask 400384   ;;  %s111_s21 = int_to_ptr.vmem [resolvable:$true] %s110_s21 }
  0x5e   :  { %120 = sst [smem:[#allocation14 + $0x3]] %s2861_s14  ;;  %s2868_s22 = smov 128   ;;  %vm814_vm12 = vcmask 154624   ;;  %vm820_vm13 = vcmask 556184   ;;  %vm806_vm14 = vcmask 802184   ;;  %vm812_vm15 = vcmask 1048336  }
  0x5f   :  { %122 = sst [smem:[#allocation14 + $0x4]] %s2868_s22  ;;  %s2869_s23 = smov [#allocation4]  }
  0x60   :  { %124 = sst [smem:[#allocation14 + $0x5]] %s2866_s3  ;;  %s2376_s9 = sshll.u32 %s102_s17, 26 }
  0x61   :  { %126 = sst [smem:[#allocation14 + $0x6]] %s2868_s22  ;;  %s2377_s16 = sadd.s32 134217728, %s2376_s9 }
  0x62   :  { %128 = sst [smem:[#allocation14 + $0x7]] %s2861_s14  ;;  %s2870_s1 = smov [#allocation13]  }
  0x63   :  { %130 = sst [smem:[#allocation14 + $0x8]] %s2862_s19  ;;  %s2872_s27 = smov 127  }
  0x64   :  { %132 = dma.general %s3334_s6, 50176, %s111_s21, %s2869_s23, %s2870_s1, [#allocation14], %s2377_s16, 0  }
  0x65   :  { %v133_v0 = vld [vmem:[%s3328_s0] sm:$0xff]  ;;  %s2873_s29 = smov 117   ;;  %s2874_s14 = smov 126   ;;  %v202_v5 = vld [vmem:[%s3330_s2 + $0x8] sm:$0xff]  ;;  %v203_v7 = vld [vmem:[%s3330_s2 + $0x10] sm:$0xff] }
  0x66   :  { %v2648_v2 = vpack.i.bf16 %v2871_v1, %v133_v0  ;;  %s2875_s19 = smov 116   ;;  %s2876_s11 = smov 115   ;;  %v2690_v3 = vld [vmem:[#allocation5] sm:$0xff]   ;;  %v204_v8 = vld [vmem:[%s3330_s2 + $0x18] sm:$0xff]  ;;  %v2691_v47 = vld [vmem:[#allocation5 + $0x8] sm:$0xff]  }
  0x67   :  { %s2877_s6 = smov 106   ;;  %2521 = vmatprep.mubr.msk.bf16.mxu0 %vm235_vm0, %v2690_v3  ;;  %s2878_s0 = smov 105   ;;  %v201_v6 = vld [vmem:[%s3330_s2] sm:$0xff]  ;;  %v409_v3 = vld [vmem:[%s3332_s4 + $0x8] sm:$0xff] }
  0x68   :  { %2649 = vrot.lane.b32.xlu0 %v2648_v2, %s2872_s27  ;;  %2659 = vrot.lane.b32.xlu1 %v2648_v2, %s2873_s29  ;;  %s2879_s8 = smov 104   ;;  %s2882_s9 = smov 19  }
  0x69   :  { %s2883_s16 = smov 49   ;;  %s2884_s23 = smov 68  }
  0x6a   :  { %s2885_s1 = smov 38   ;;  %s2886_s30 = smov 87  }
  0x6b   :  { %s2888_s24 = smov 16   ;;  %s2889_s25 = smov 24  }
  0x6c   :  { %2654 = vrot.lane.b32.xlu0 %v2648_v2, %s2874_s14  ;;  %2664 = vrot.lane.b32.xlu1 %v2648_v2, %s2875_s19  ;;  %s2890_s26 = smov 32  }
  0x70   :  { %2669 = vrot.lane.b32.xlu0 %v2648_v2, %s2876_s11  ;;  %2674 = vrot.lane.b32.xlu1 %v2648_v2, %s2877_s6 }
  0x74   :  { %2679 = vrot.lane.b32.xlu0 %v2648_v2, %s2878_s0  ;;  %2684 = vrot.lane.b32.xlu1 %v2648_v2, %s2879_s8  ;;  %v2694_v2 = vld [vmem:[#allocation7 + $0x4] ss:$12 sps:$4 sm:$0xff]  }
  0x78   :  { %212 = vperm.xlu1 %2689, %v202_v5   ;;  %207 = vperm.xlu0 %2688, %v201_v6   ;;  %v408_v5 = vld [vmem:[%s3332_s4] sm:$0xff]  ;;  %v411_v6 = vld [vmem:[%s3332_s4 + $0x18] sm:$0xff] }
  0x7c   :  { %217 = vperm.xlu1 %2689, %v203_v7   ;;  %222 = vperm.xlu0 %2688, %v204_v8   ;;  %v410_v7 = vld [vmem:[%s3332_s4 + $0x10] sm:$0xff]  ;;  %v413_v8 = vld [vmem:[%s3332_s4 + $0x28] sm:$0xff] }
  0x80   :  { %350 = vrot.lane.b32.xlu1 %v2880_v4, %s2876_s11  ;;  %339 = vrot.lane.b32.xlu0 %v2880_v4, %s2875_s19 }
  0xda   :  { %v2650_v9 = vpop.permute.xlu0 %2649  ;;  %v2660_v10 = vpop.permute.xlu1 %2659 }
  0xdb   :  { %v2652_v11 = vunpack.i.h.bf16 %v2650_v9  ;;  %v2651_v12 = vunpack.i.l.bf16 %v2650_v9  ;;  %v2662_v13 = vunpack.i.h.bf16 %v2660_v10  ;;  %v2661_v14 = vunpack.i.l.bf16 %v2660_v10  ;;  %v412_v9 = vld [vmem:[%s3332_s4 + $0x20] sm:$0xff]  ;;  %v415_v10 = vld [vmem:[%s3332_s4 + $0x38] sm:$0xff] }
  0xdd   :  { %v141_v15 = vsel %vm140_vm1, %v2651_v12, %v2652_v11  ;;  %v155_v19 = vsel %vm154_vm2, %v2661_v14, %v2662_v13  ;;  %v414_v11 = vld [vmem:[%s3332_s4 + $0x30] sm:$0xff] }
  0xde   :  { %v2655_v16 = vpop.permute.xlu0 %2654  ;;  %v196_v17 = vpack.c.bf16 %v141_v15, %v133_v0  ;;  %v2665_v18 = vpop.permute.xlu1 %2664 }
  0xdf   :  { %v2657_v20 = vunpack.i.h.bf16 %v2655_v16  ;;  %v2656_v21 = vunpack.i.l.bf16 %v2655_v16  ;;  %v2667_v22 = vunpack.i.h.bf16 %v2665_v18  ;;  %v2666_v23 = vunpack.i.l.bf16 %v2665_v18 }
  0xe0   :  { %2511 = vmatprep.subr.bf16.mxu0 %v196_v17 }
  0xe1   :  { %2512 = vmatpush3.bf16.msra.mxu0 %v196_v17  ;;  %v148_v24 = vsel %vm147_vm3, %v2656_v21, %v2657_v20  ;;  %v162_v28 = vsel %vm161_vm4, %v2666_v23, %v2667_v22 }
  0xe2   :  { %v2670_v25 = vpop.permute.xlu0 %2669  ;;  %v197_v26 = vpack.c.bf16 %v155_v19, %v148_v24  ;;  %v2675_v27 = vpop.permute.xlu1 %2674 }
  0xe3   :  { %v2672_v29 = vunpack.i.h.bf16 %v2670_v25  ;;  %v2671_v30 = vunpack.i.l.bf16 %v2670_v25  ;;  %v2677_v31 = vunpack.i.h.bf16 %v2675_v27  ;;  %v2676_v32 = vunpack.i.l.bf16 %v2675_v27 }
  0xe4   :  { %2513 = vmatprep.subr.bf16.mxu0 %v197_v26 }
  0xe5   :  { %2514 = vmatpush3.bf16.msra.mxu0 %v197_v26  ;;  %v169_v33 = vsel %vm168_vm5, %v2671_v30, %v2672_v29  ;;  %v176_v37 = vsel %vm175_vm6, %v2676_v32, %v2677_v31 }
  0xe6   :  { %v2680_v34 = vpop.permute.xlu0 %2679  ;;  %v198_v35 = vpack.c.bf16 %v169_v33, %v162_v28  ;;  %v2685_v36 = vpop.permute.xlu1 %2684 }
  0xe7   :  { %v2682_v38 = vunpack.i.h.bf16 %v2680_v34  ;;  %v2681_v39 = vunpack.i.l.bf16 %v2680_v34  ;;  %v2687_v40 = vunpack.i.h.bf16 %v2685_v36  ;;  %v2686_v41 = vunpack.i.l.bf16 %v2685_v36 }
  0xe8   :  { %2515 = vmatprep.subr.bf16.mxu0 %v198_v35 }
  0xe9   :  { %2516 = vmatpush3.bf16.msra.mxu0 %v198_v35  ;;  %v190_v42 = vsel %vm189_vm7, %v2686_v41, %v2687_v40  ;;  %v183_v43 = vsel %vm182_vm8, %v2681_v39, %v2682_v38 }
  0xea   :  { %v200_v44 = vpack.c.bf16 %v190_v42, %v190_v42  ;;  %v199_v45 = vpack.c.bf16 %v183_v43, %v176_v37 }
  0xec   :  { %2517 = vmatprep.subr.bf16.mxu0 %v199_v45  ;;  %v244_v46 = vsel %vm242_vm9, %v200_v44, 0 }
  0xed   :  { %2518 = vmatpush3.bf16.msra.mxu0 %v199_v45 }
  0xee   :  { %2609 = vmatprep.subr.msk.bf16.mxu0 %vm242_vm9, %v200_v44  ;;  %vm1167_vm9 = vcmask 392192  }
  0xf1   :  { %2520 = vmatpush3.bf16.msra.mxu0 %v244_v46 }
  0xf4   :  { %2522 = vmatmul.mubr.msk.bf16.vlgmr.msra.gmra.mrb[0].mxu0 %vm235_vm0, %v2691_v47  ;;  %vm826_vm0 = vcmask 957984  }
  0xf5   :  { %561 = vmatprep.mubr.bf16.mxu0 %v2694_v2  ;;  %v2711_v2 = vld [vmem:[%s3333_s5 + $0x18] sm:$0xff]  }
  0xf7   :  { %v213_v48 = vpop.permute.xlu1 %212  ;;  %v208_v49 = vpop.permute.xlu0 %207 }
  0xfb   :  { %v218_v50 = vpop.permute.xlu1 %217  ;;  %v223_v54 = vpop.permute.xlu0 %222 }
  0xff   :  { %v351_v12 = vpop.permute.xlu1 %350  ;;  %v340_v13 = vpop.permute.xlu0 %339 }
 0x1c7   :  { %v2523_v51 = vpop.f32.mrb[0].mxu0 }
 0x1c8   :  { %v289_v52 = vadd.f32 %v2523_v51, %v218_v50  ;;  %v280_v53 = vpop.f32.mrb[1].mxu0 }
 0x1c9   :  { %v281_v55 = vadd.f32 %v280_v53, %v208_v49  ;;  %v2524_v56 = vpop.f32.mrb[2].mxu0  ;;  %v2695_v49 = vld [vmem:[#allocation7 + $0x1c] ss:$12 sps:$4 sm:$0xff]  }
 0x1ca   :  { %v292_v57 = vadd.f32 %v2524_v56, %v223_v54  ;;  %v283_v58 = vpop.f32.mrb[3].mxu0  ;;  %v297_v60 = vmax.f32 %v289_v52, 0.0  ;;  %v2697_v54 = vld [vmem:[#allocation7 + $0x18] ss:$12 sps:$4 sm:$0xff]   ;;  %v2700_v56 = vld [vmem:[#allocation7 + $0x30] ss:$12 sps:$4 sm:$0xff]  }
 0x1cb   :  { %v284_v59 = vadd.f32 %v283_v58, %v213_v48  ;;  %v295_v62 = vmax.f32 %v281_v55, 0.0  ;;  %v2692_v48 = vld [vmem:[#allocation7] ss:$12 sps:$4 sm:$0xff]   ;;  %v2703_v58 = vld [vmem:[#allocation7 + $0x48] ss:$12 sps:$4 sm:$0xff]  }
 0x1cc   :  { %v298_v61 = vmax.f32 %v292_v57, 0.0  ;;  %v2698_v55 = vld [vmem:[#allocation7 + $0x34] ss:$12 sps:$4 sm:$0xff]   ;;  %v2701_v57 = vld [vmem:[#allocation7 + $0x4c] ss:$12 sps:$4 sm:$0xff]  }
 0x1cd   :  { %v296_v63 = vmax.f32 %v284_v59, 0.0  ;;  %v2704_v59 = vld [vmem:[#allocation7 + $0x8] ss:$12 sps:$4 sm:$0xff]  }
 0x1ce   :  { %v300_v0 = vpack.c.bf16 %v298_v61, %v297_v60  ;;  %v2705_v60 = vld [vmem:[#allocation7 + $0x20] ss:$12 sps:$4 sm:$0xff]   ;;  %v2706_v61 = vld [vmem:[#allocation7 + $0x38] ss:$12 sps:$4 sm:$0xff]  }
 0x1cf   :  { %v299_v1 = vpack.c.bf16 %v296_v63, %v295_v62  ;;  %v2707_v62 = vld [vmem:[#allocation7 + $0x50] ss:$12 sps:$4 sm:$0xff]  }
 0x1d0   :  { %352 = vrot.lane.b32.xlu0 %v300_v0, %s2876_s11  ;;  %341 = vrot.lane.b32.xlu1 %v300_v0, %s2875_s19  ;;  %v2708_v63 = vld [vmem:[%s3333_s5] sm:$0xff]  }
 0x1d4   :  { %363 = vrot.lane.b32.xlu0 %v300_v0, %s2877_s6  ;;  %337 = vrot.lane.b32.xlu1 %v299_v1, %s2875_s19  ;;  %s2893_s19 = smov 56  }
 0x1d8   :  { %348 = vrot.lane.b32.xlu0 %v299_v1, %s2876_s11  ;;  %306 = vrot.lane.b32.xlu1 %v2880_v4, %s2872_s27 }
 0x1dc   :  { %304 = vrot.lane.b32.xlu0 %v299_v1, %s2872_s27  ;;  %308 = vrot.lane.b32.xlu1 %v300_v0, %s2872_s27  ;;  %s2891_s27 = smov 40  }
 0x1e0   :  { %359 = vrot.lane.b32.xlu0 %v299_v1, %s2877_s6  ;;  %361 = vrot.lane.b32.xlu1 %v2880_v4, %s2877_s6 }
 0x1e4   :  { %315 = vrot.lane.b32.xlu0 %v299_v1, %s2874_s14  ;;  %317 = vrot.lane.b32.xlu1 %v2880_v4, %s2874_s14 }
 0x1e8   :  { %370 = vrot.lane.b32.xlu0 %v299_v1, %s2878_s0  ;;  %319 = vrot.lane.b32.xlu1 %v300_v0, %s2874_s14  ;;  %s2892_s14 = smov 48  }
 0x1ec   :  { %326 = vrot.lane.b32.xlu0 %v299_v1, %s2873_s29  ;;  %372 = vrot.lane.b32.xlu1 %v2880_v4, %s2878_s0 }
 0x1f0   :  { %374 = vrot.lane.b32.xlu0 %v300_v0, %s2878_s0  ;;  %328 = vrot.lane.b32.xlu1 %v2880_v4, %s2873_s29 }
 0x1f4   :  { %381 = vrot.lane.b32.xlu0 %v299_v1, %s2879_s8  ;;  %330 = vrot.lane.b32.xlu1 %v300_v0, %s2873_s29 }
 0x1f8   :  { %385 = vrot.lane.b32.xlu0 %v300_v0, %s2879_s8  ;;  %383 = vrot.lane.b32.xlu1 %v2880_v4, %s2879_s8 }
 0x1fc   :  { %423 = vperm.xlu0 %2688, %v409_v3   ;;  %418 = vperm.xlu1 %2689, %v408_v5   ;;  %v2712_v3 = vld [vmem:[%s3333_s5 + $0x20] sm:$0xff]   ;;  %v2713_v5 = vld [vmem:[%s3333_s5 + $0x28] sm:$0xff]  }
 0x200   :  { %433 = vperm.xlu0 %2688, %v411_v6   ;;  %428 = vperm.xlu1 %2689, %v410_v7   ;;  %v2714_v6 = vld [vmem:[%s3333_s5 + $0x30] sm:$0xff]   ;;  %v2715_v7 = vld [vmem:[%s3333_s5 + $0x38] sm:$0xff]  }
 0x204   :  { %443 = vperm.xlu0 %2688, %v413_v8   ;;  %438 = vperm.xlu1 %2689, %v412_v9  }
 0x208   :  { %453 = vperm.xlu0 %2688, %v415_v10   ;;  %448 = vperm.xlu1 %2689, %v414_v11  }
 0x242   :  { %v353_v14 = vpop.permute.xlu0 %352  ;;  %v342_v15 = vpop.permute.xlu1 %341 }
 0x243   :  { %v345_v19 = vsel %vm161_vm4, %v342_v15, %v340_v13  ;;  %v356_v26 = vsel %vm168_vm5, %v353_v14, %v351_v12 }
 0x246   :  { %v364_v16 = vpop.permute.xlu0 %363  ;;  %v338_v17 = vpop.permute.xlu1 %337 }
 0x247   :  { %v344_v18 = vsel %vm161_vm4, %v338_v17, %v340_v13  ;;  %vm846_vm4 = vcmask 1048248  }
 0x248   :  { %2431 = vmatprep.subr.bf16.mxu0 %v344_v18 }
 0x249   :  { %2432 = vmatpush3.bf16.msra.mxu0 %v299_v1  ;;  %v2710_v1 = vld [vmem:[%s3333_s5 + $0x10] sm:$0xff]  }
 0x24a   :  { %v349_v20 = vpop.permute.xlu0 %348  ;;  %2433 = vmatprep.subr.bf16.mxu0 %v345_v19  ;;  %v307_v21 = vpop.permute.xlu1 %306 }
 0x24b   :  { %v355_v22 = vsel %vm168_vm5, %v349_v20, %v351_v12  ;;  %vm848_vm5 = vcmask 64512  }
 0x24d   :  { %2434 = vmatpush3.bf16.msra.mxu0 %v300_v0  ;;  %v2709_v0 = vld [vmem:[%s3333_s5 + $0x8] sm:$0xff]   ;;  %s2881_s5 = smov 98  }
 0x24e   :  { %v305_v23 = vpop.permute.xlu0 %304  ;;  %2435 = vmatprep.subr.bf16.mxu0 %v355_v22  ;;  %v309_v24 = vpop.permute.xlu1 %308 }
 0x24f   :  { %v311_v25 = vsel %vm140_vm1, %v305_v23, %v307_v21  ;;  %v312_v29 = vsel %vm140_vm1, %v309_v24, %v307_v21  ;;  %vm832_vm1 = vcmask 1048488  }
 0x251   :  { %2436 = vmatpush3.bf16.msra.mxu0 %v311_v25 }
 0x252   :  { %v360_v27 = vpop.permute.xlu0 %359  ;;  %2437 = vmatprep.subr.bf16.mxu0 %v356_v26  ;;  %v362_v28 = vpop.permute.xlu1 %361 }
 0x253   :  { %v366_v30 = vsel %vm175_vm6, %v360_v27, %v362_v28  ;;  %v367_v34 = vsel %vm175_vm6, %v364_v16, %v362_v28  ;;  %vm1095_vm6 = vcmask 130048  }
 0x255   :  { %2438 = vmatpush3.bf16.msra.mxu0 %v312_v29 }
 0x256   :  { %v316_v31 = vpop.permute.xlu0 %315  ;;  %2439 = vmatprep.subr.bf16.mxu0 %v366_v30  ;;  %v318_v32 = vpop.permute.xlu1 %317 }
 0x257   :  { %v322_v33 = vsel %vm147_vm3, %v316_v31, %v318_v32 }
 0x259   :  { %2440 = vmatpush3.bf16.msra.mxu0 %v322_v33 }
 0x25a   :  { %v371_v35 = vpop.permute.xlu0 %370  ;;  %2441 = vmatprep.subr.bf16.mxu0 %v367_v34  ;;  %v320_v36 = vpop.permute.xlu1 %319 }
 0x25b   :  { %v323_v37 = vsel %vm147_vm3, %v320_v36, %v318_v32  ;;  %vm840_vm3 = vcmask 711984  }
 0x25d   :  { %2442 = vmatpush3.bf16.msra.mxu0 %v323_v37 }
 0x25e   :  { %v327_v38 = vpop.permute.xlu0 %326  ;;  %v373_v39 = vpop.permute.xlu1 %372 }
 0x25f   :  { %v377_v40 = vsel %vm182_vm8, %v371_v35, %v373_v39 }
 0x260   :  { %2443 = vmatprep.subr.bf16.mxu0 %v377_v40 }
 0x262   :  { %v375_v41 = vpop.permute.xlu0 %374  ;;  %v329_v42 = vpop.permute.xlu1 %328 }
 0x263   :  { %v333_v43 = vsel %vm154_vm2, %v327_v38, %v329_v42  ;;  %v378_v44 = vsel %vm182_vm8, %v375_v41, %v373_v39  ;;  %vm1149_vm8 = vcmask 326656  }
 0x264   :  { %2444 = vmatpush3.bf16.msra.mxu0 %v333_v43 }
 0x265   :  { %2445 = vmatprep.subr.bf16.mxu0 %v378_v44 }
 0x266   :  { %v382_v45 = vpop.permute.xlu0 %381  ;;  %v331_v46 = vpop.permute.xlu1 %330 }
 0x267   :  { %v334_v47 = vsel %vm154_vm2, %v331_v46, %v329_v42  ;;  %vm834_vm2 = vcmask 310272  }
 0x268   :  { %2446 = vmatpush3.bf16.msra.mxu0 %v334_v47 }
 0x26a   :  { %v386_v50 = vpop.permute.xlu0 %385  ;;  %v384_v51 = vpop.permute.xlu1 %383 }
 0x26b   :  { %562 = vmatmul.mubr.bf16.vlgmr.msra.gmra.mrb[4].mxu0 %v2692_v48  ;;  %v388_v52 = vsel %vm189_vm7, %v382_v45, %v384_v51  ;;  %v389_v53 = vsel %vm189_vm7, %v386_v50, %v384_v51  ;;  %vm1113_vm7 = vcmask 195584  }
 0x26c   :  { %2525 = vmatprep.subr.bf16.mxu0 %v388_v52  ;;  %569 = vmatprep.mubr.bf16.mxu0 %v2695_v49 }
 0x26d   :  { %2526 = vmatpush3.bf16.msra.mxu0 %v388_v52 }
 0x26e   :  { %2527 = vmatprep.subr.bf16.mxu0 %v389_v53 }
 0x271   :  { %2528 = vmatpush3.bf16.msra.mxu0 %v389_v53 }
 0x272   :  { %2537 = vmatprep.subr.bf16.mxu0 %v2708_v63 }
 0x273   :  { %570 = vmatmul.mubr.bf16.gmra.mrb[8].mxu0 %v2697_v54 }
 0x274   :  { %577 = vmatprep.mubr.bf16.mxu0 %v2698_v55 }
 0x27b   :  { %578 = vmatmul.mubr.bf16.gmra.mrb[12].mxu0 %v2700_v56  ;;  %v419_v25 = vpop.permute.xlu1 %418  ;;  %v424_v27 = vpop.permute.xlu0 %423 }
 0x27c   :  { %585 = vmatprep.mubr.bf16.mxu0 %v2701_v57 }
 0x27f   :  { %v429_v30 = vpop.permute.xlu1 %428  ;;  %v434_v34 = vpop.permute.xlu0 %433 }
 0x283   :  { %586 = vmatmul.mubr.bf16.gmra.mrb[16].mxu0 %v2703_v58  ;;  %v439_v37 = vpop.permute.xlu1 %438  ;;  %v444_v43 = vpop.permute.xlu0 %443 }
 0x284   :  { %2529 = vmatprep.mubr.msk.bf16.mxu0 %vm516_vm10, %v2704_v59 }
 0x287   :  { %v449_v52 = vpop.permute.xlu1 %448  ;;  %v454_v57 = vpop.permute.xlu0 %453 }
 0x28b   :  { %2530 = vmatmul.mubr.msk.bf16.vlgmr.msra.gmra.mrb[20].mxu0 %vm516_vm10, %v2705_v60 }
 0x28c   :  { %2533 = vmatprep.mubr.msk.bf16.mxu0 %vm516_vm10, %v2706_v61  ;;  %2538 = vmatpush3.bf16.msra.mxu0 %v2708_v63 }
 0x28d   :  { %2539 = vmatprep.subr.bf16.mxu0 %v2709_v0 }
 0x290   :  { %2540 = vmatpush3.bf16.msra.mxu0 %v2709_v0 }
 0x291   :  { %2541 = vmatprep.subr.bf16.mxu0 %v2710_v1 }
 0x293   :  { %2534 = vmatmul.mubr.msk.bf16.gmra.mrb[24].mxu0 %vm516_vm10, %v2707_v62 }
 0x294   :  { %2542 = vmatpush3.bf16.msra.mxu0 %v2710_v1 }
 0x295   :  { %2543 = vmatprep.subr.bf16.mxu0 %v2711_v2 }
 0x298   :  { %2544 = vmatpush3.bf16.msra.mxu0 %v2711_v2 }
 0x299   :  { %2545 = vmatprep.subr.bf16.mxu0 %v2712_v3 }
 0x29c   :  { %2546 = vmatpush3.bf16.msra.mxu0 %v2712_v3 }
 0x29d   :  { %2547 = vmatprep.subr.bf16.mxu0 %v2713_v5 }
 0x2a0   :  { %2548 = vmatpush3.bf16.msra.mxu0 %v2713_v5 }
 0x2a1   :  { %2549 = vmatprep.subr.bf16.mxu0 %v2714_v6 }
 0x2a4   :  { %2550 = vmatpush3.bf16.msra.mxu0 %v2714_v6 }
 0x2a5   :  { %2551 = vmatprep.subr.bf16.mxu0 %v2715_v7 }
 0x2a8   :  { %2552 = vmatpush3.bf16.msra.mxu0 %v2715_v7 }
 0x33e   :  { %v2447_v8 = vpop.f32.mrb[4].mxu0 }
 0x33f   :  { %v2448_v9 = vpop.f32.mrb[5].mxu0 }
 0x340   :  { %v2449_v10 = vadd.f32 %v2448_v9, %v2447_v8  ;;  %v2450_v11 = vpop.f32.mrb[6].mxu0 }
 0x341   :  { %v2451_v12 = vpop.f32.mrb[7].mxu0 }
 0x342   :  { %v2452_v13 = vadd.f32 %v2451_v12, %v2450_v11  ;;  %v564_v39 = vadd.f32 %v2449_v10, %v419_v25 }
 0x344   :  { %v567_v46 = vadd.f32 %v2452_v13, %v424_v27  ;;  %v852_v27 = vlaneseq }
 0x346   :  { %v2453_v14 = vpop.f32.mrb[8].mxu0 }
 0x347   :  { %v2454_v15 = vpop.f32.mrb[9].mxu0 }
 0x348   :  { %v2455_v16 = vadd.f32 %v2454_v15, %v2453_v14  ;;  %v2456_v17 = vpop.f32.mrb[10].mxu0 }
 0x349   :  { %v2457_v18 = vpop.f32.mrb[11].mxu0 }
 0x34a   :  { %v2458_v19 = vadd.f32 %v2457_v18, %v2456_v17  ;;  %v572_v36 = vadd.f32 %v2455_v16, %v429_v30 }
 0x34c   :  { %v575_v42 = vadd.f32 %v2458_v19, %v434_v34 }
 0x34e   :  { %v2459_v20 = vpop.f32.mrb[12].mxu0 }
 0x34f   :  { %v2460_v21 = vpop.f32.mrb[13].mxu0 }
 0x350   :  { %v2461_v22 = vadd.f32 %v2460_v21, %v2459_v20  ;;  %v2462_v23 = vpop.f32.mrb[14].mxu0 }
 0x351   :  { %v2463_v24 = vpop.f32.mrb[15].mxu0 }
 0x352   :  { %v2464_v26 = vadd.f32 %v2463_v24, %v2462_v23  ;;  %v580_v60 = vadd.f32 %v2461_v22, %v439_v37 }
 0x354   :  { %v583_v2 = vadd.f32 %v2464_v26, %v444_v43 }
 0x356   :  { %v2465_v28 = vpop.f32.mrb[16].mxu0 }
 0x357   :  { %v2466_v29 = vpop.f32.mrb[17].mxu0 }
 0x358   :  { %v2467_v31 = vadd.f32 %v2466_v29, %v2465_v28  ;;  %v2468_v32 = vpop.f32.mrb[18].mxu0  ;;  %v853_v29 = vshrl.u32 %v852_v27, 7 }
 0x359   :  { %v2469_v33 = vpop.f32.mrb[19].mxu0 }
 0x35a   :  { %v2470_v35 = vadd.f32 %v2469_v33, %v2468_v32  ;;  %v588_v56 = vadd.f32 %v2467_v31, %v449_v52  ;;  %v3159_v30 = vsub.s32 3, %v853_v29  ;;  %v3161_v31 = vsub.s32 2, %v853_v29 }
 0x35c   :  { %v591_v63 = vadd.f32 %v2470_v35, %v454_v57 }
 0x35e   :  { %v2531_v38 = vpop.f32.mrb[20].mxu0 }
 0x35f   :  { %v637_v40 = vadd.f32 %v2531_v38, %v572_v36  ;;  %v628_v41 = vpop.f32.mrb[21].mxu0 }
 0x360   :  { %v629_v44 = vadd.f32 %v628_v41, %v564_v39  ;;  %v2532_v45 = vpop.f32.mrb[22].mxu0 }
 0x361   :  { %v640_v47 = vadd.f32 %v2532_v45, %v575_v42  ;;  %v631_v48 = vpop.f32.mrb[23].mxu0  ;;  %v661_v50 = vmax.f32 %v637_v40, 0.0 }
 0x362   :  { %v632_v49 = vadd.f32 %v631_v48, %v567_v46  ;;  %v659_v53 = vmax.f32 %v629_v44, 0.0  ;;  %v3175_v48 = vsub.s32 0, %v853_v29 }
 0x363   :  { %v662_v51 = vmax.f32 %v640_v47, 0.0 }
 0x364   :  { %v660_v54 = vmax.f32 %v632_v49, 0.0 }
 0x365   :  { %v668_v55 = vpack.c.bf16 %v662_v51, %v661_v50  ;;  %v3177_v51 = vsub.s32 1, %v853_v29 }
 0x366   :  { %v667_v58 = vpack.c.bf16 %v660_v54, %v659_v53  ;;  %v2535_v59 = vpop.f32.mrb[24].mxu0 }
 0x367   :  { %v653_v61 = vadd.f32 %v2535_v59, %v588_v56  ;;  %v644_v62 = vpop.f32.mrb[25].mxu0 }
 0x368   :  { %v645_v0 = vadd.f32 %v644_v62, %v580_v60  ;;  %v2536_v1 = vpop.f32.mrb[26].mxu0  ;;  %2553 = vmatprep.mubr.bf16.mxu0 %v667_v58 }
 0x369   :  { %v656_v3 = vadd.f32 %v2536_v1, %v591_v63  ;;  %v647_v5 = vpop.f32.mrb[27].mxu0  ;;  %2554 = vmatmul.mubr.bf16.vlgmr.msra.gmra.mrb[28].mxu0 %v668_v55  ;;  %v665_v7 = vmax.f32 %v653_v61, 0.0 }
 0x36a   :  { %v648_v6 = vadd.f32 %v647_v5, %v583_v2  ;;  %v663_v9 = vmax.f32 %v645_v0, 0.0 }
 0x36b   :  { %v666_v8 = vmax.f32 %v656_v3, 0.0 }
 0x36c   :  { %v664_v10 = vmax.f32 %v648_v6, 0.0 }
 0x36d   :  { %v670_v11 = vpack.c.bf16 %v666_v8, %v665_v7 }
 0x36e   :  { %v669_v12 = vpack.c.bf16 %v664_v10, %v663_v9 }
 0x370   :  { %2557 = vmatprep.mubr.bf16.mxu0 %v669_v12 }
 0x371   :  { %2558 = vmatmul.mubr.bf16.gmra.mrb[32].mxu0 %v670_v11 }
 0x43c   :  { %v2555_v13 = vpop.f32.mrb[28].mxu0 }
 0x43d   :  { %809 = vrot.lane.b32.xlu1 %v2555_v13, %s2881_s5  ;;  %v769_v14 = vpop.f32.mrb[29].mxu0 }
 0x43e   :  { %801 = vst.msk [vmem:[#allocation2] sm:$0xff] %vm800_vm11, %v769_v14  ;;  %v2556_v15 = vpop.f32.mrb[30].mxu0 }
 0x43f   :  { %817 = vrot.lane.b32.xlu0 %v2556_v15, %s2882_s9  ;;  %v772_v16 = vpop.f32.mrb[31].mxu0 }
 0x443   :  { %803 = vrot.lane.b32.xlu0 %v772_v16, %s2883_s16 }
 0x444   :  { %v2559_v17 = vpop.f32.mrb[32].mxu0 }
 0x445   :  { %v785_v18 = vpop.f32.mrb[33].mxu0 }
 0x446   :  { %823 = vrot.lane.b32.xlu1 %v785_v18, %s2884_s23  ;;  %v2560_v19 = vpop.f32.mrb[34].mxu0 }
 0x447   :  { %837 = vrot.lane.b32.xlu0 %v2559_v17, %s2885_s1  ;;  %v788_v20 = vpop.f32.mrb[35].mxu0 }
 0x44a   :  { %829 = vrot.lane.b32.xlu1 %v788_v20, %s2873_s29  ;;  %s2887_s29 = smov 8  }
 0x44e   :  { %843 = vrot.lane.b32.xlu1 %v2560_v19, %s2886_s30 }
 0x4af   :  { %v810_v21 = vpop.permute.xlu1 %809 }
 0x4b0   :  { %815 = vst.msk [vmem:[#allocation2 + $0x8] sm:$0xff] %vm814_vm12, %v810_v21 }
 0x4b1   :  { %v818_v22 = vpop.permute.xlu0 %817 }
 0x4b2   :  { %821 = vst.msk [vmem:[#allocation2 + $0x8] sm:$0xff] %vm820_vm13, %v818_v22 }
 0x4b5   :  { %v804_v23 = vpop.permute.xlu0 %803 }
 0x4b6   :  { %807 = vst.msk [vmem:[#allocation2] sm:$0xff] %vm806_vm14, %v804_v23 }
 0x4b7   :  { %813 = vst.msk [vmem:[#allocation2] sm:$0xff] %vm812_vm15, %v810_v21 }
 0x4b8   :  { %v824_v24 = vpop.permute.xlu1 %823 }
 0x4b9   :  { %827 = vst.msk [vmem:[#allocation2 + $0x8] sm:$0xff] %vm826_vm0, %v824_v24  ;;  %v838_v26 = vpop.permute.xlu0 %837 }
 0x4bc   :  { %v830_v25 = vpop.permute.xlu1 %829 }
 0x4bd   :  { %833 = vst.msk [vmem:[#allocation2 + $0x8] sm:$0xff] %vm832_vm1, %v830_v25 }
 0x4be   :  { %835 = vst.msk [vmem:[#allocation2 + $0x10] sm:$0xff] %vm834_vm2, %v830_v25 }
 0x4bf   :  { %841 = vst.msk [vmem:[#allocation2 + $0x10] sm:$0xff] %vm840_vm3, %v838_v26 }
 0x4c0   :  { %v844_v28 = vpop.permute.xlu1 %843 }
 0x4c1   :  { %847 = vst.msk [vmem:[#allocation2 + $0x10] sm:$0xff] %vm846_vm4, %v844_v28 }
 0x4c2   :  { %849 = vst.msk [vmem:[#allocation2 + $0x18] sm:$0xff] %vm848_vm5, %v844_v28 }
 0x4c9   :  { %v877_v32 = vld [vmem:[#allocation2 + $0x1] ss:$8 sm:$0xf]  ;;  %v904_v33 = vld [vmem:[#allocation2 + $0x2] ss:$8 sm:$0xf] }
 0x4ca   :  { %v894_v34 = vrot.slane %v877_v32, %v3159_v30  ;;  %v890_v35 = vrot.slane %v877_v32, %v3161_v31  ;;  %v921_v38 = vrot.slane %v904_v33, %v3159_v30  ;;  %v917_v39 = vrot.slane %v904_v33, %v3161_v31  ;;  %v931_v40 = vld [vmem:[#allocation2 + $0x3] ss:$8 sm:$0xf]  ;;  %v958_v45 = vld [vmem:[#allocation2 + $0x4] ss:$8 sm:$0xf] }
 0x4cb   :  { %v948_v43 = vrot.slane %v931_v40, %v3159_v30  ;;  %v944_v44 = vrot.slane %v931_v40, %v3161_v31  ;;  %v975_v46 = vrot.slane %v958_v45, %v3159_v30  ;;  %v971_v47 = vrot.slane %v958_v45, %v3161_v31  ;;  %v3179_v52 = vld [vmem:[#allocation2] ss:$8 sm:$0xf]  ;;  %v985_v53 = vld [vmem:[#allocation2 + $0x5] ss:$8 sm:$0xf] }
 0x4cc   :  { %v902_v36 = vpack.c.bf16 %v894_v34, %v894_v34  ;;  %v901_v37 = vpack.c.bf16 %v890_v35, %v890_v35  ;;  %v929_v41 = vpack.c.bf16 %v921_v38, %v921_v38  ;;  %v928_v42 = vpack.c.bf16 %v917_v39, %v917_v39  ;;  %v1012_v61 = vld [vmem:[#allocation2 + $0x6] ss:$8 sm:$0xf] }
 0x4cd   :  { %v956_v49 = vpack.c.bf16 %v948_v43, %v948_v43  ;;  %v955_v50 = vpack.c.bf16 %v944_v44, %v944_v44  ;;  %v983_v54 = vpack.c.bf16 %v975_v46, %v975_v46  ;;  %v982_v55 = vpack.c.bf16 %v971_v47, %v971_v47 }
 0x4ce   :  { %1075 = vrot.lane.b32.xlu1 %v902_v36, %s2887_s29  ;;  %1073 = vrot.lane.b32.xlu0 %v901_v37, %s2887_s29  ;;  %v3185_v56 = vrot.slane %v3179_v52, %v3175_v48  ;;  %v1002_v57 = vrot.slane %v985_v53, %v3159_v30  ;;  %v998_v58 = vrot.slane %v985_v53, %v3161_v31 }
 0x4cf   :  { %v3191_v59 = vrot.slane %v3179_v52, %v3177_v51  ;;  %v3195_v60 = vrot.slane %v3179_v52, %v3161_v31  ;;  %v1029_v3 = vrot.slane %v1012_v61, %v3159_v30  ;;  %v1025_v5 = vrot.slane %v1012_v61, %v3161_v31 }
 0x4d0   :  { %v872_v62 = vpack.c.bf16 %v3185_v56, %v3185_v56  ;;  %v1010_v1 = vpack.c.bf16 %v1002_v57, %v1002_v57  ;;  %v1009_v2 = vpack.c.bf16 %v998_v58, %v998_v58  ;;  %v886_v8 = vrot.slane %v877_v32, %v3177_v51 }
 0x4d1   :  { %v873_v63 = vpack.c.bf16 %v3191_v59, %v3191_v59  ;;  %v874_v0 = vpack.c.bf16 %v3195_v60, %v3195_v60  ;;  %v1037_v6 = vpack.c.bf16 %v1029_v3, %v1029_v3  ;;  %v1036_v7 = vpack.c.bf16 %v1025_v5, %v1025_v5 }
 0x4d2   :  { %1093 = vrot.lane.b32.xlu1 %v929_v41, %s2888_s24  ;;  %1091 = vrot.lane.b32.xlu0 %v928_v42, %s2888_s24  ;;  %v882_v9 = vrot.slane %v877_v32, %v3175_v48  ;;  %v900_v10 = vpack.c.bf16 %v886_v8, %v886_v8  ;;  %v913_v12 = vrot.slane %v904_v33, %v3177_v51 }
 0x4d3   :  { %v909_v13 = vrot.slane %v904_v33, %v3175_v48  ;;  %v940_v16 = vrot.slane %v931_v40, %v3177_v51  ;;  %v936_v17 = vrot.slane %v931_v40, %v3175_v48  ;;  %v967_v20 = vrot.slane %v958_v45, %v3177_v51  ;;  %v1039_v33 = vld [vmem:[#allocation2 + $0x7] ss:$8 sm:$0xf] }
 0x4d4   :  { %v899_v11 = vpack.c.bf16 %v882_v9, %v882_v9  ;;  %v927_v14 = vpack.c.bf16 %v913_v12, %v913_v12  ;;  %v963_v21 = vrot.slane %v958_v45, %v3175_v48  ;;  %v994_v24 = vrot.slane %v985_v53, %v3177_v51 }
 0x4d5   :  { %v926_v15 = vpack.c.bf16 %v909_v13, %v909_v13  ;;  %v954_v18 = vpack.c.bf16 %v940_v16, %v940_v16  ;;  %v953_v19 = vpack.c.bf16 %v936_v17, %v936_v17  ;;  %v981_v22 = vpack.c.bf16 %v967_v20, %v967_v20 }
 0x4d6   :  { %1111 = vrot.lane.b32.xlu1 %v956_v49, %s2889_s25  ;;  %1109 = vrot.lane.b32.xlu0 %v955_v50, %s2889_s25  ;;  %v980_v23 = vpack.c.bf16 %v963_v21, %v963_v21  ;;  %v990_v25 = vrot.slane %v985_v53, %v3175_v48  ;;  %v1008_v26 = vpack.c.bf16 %v994_v24, %v994_v24 }
 0x4d7   :  { %v1021_v29 = vrot.slane %v1012_v61, %v3177_v51  ;;  %v1017_v32 = vrot.slane %v1012_v61, %v3175_v48  ;;  %v1048_v36 = vrot.slane %v1039_v33, %v3177_v51  ;;  %v1044_v37 = vrot.slane %v1039_v33, %v3175_v48 }
 0x4d8   :  { %v1007_v28 = vpack.c.bf16 %v990_v25, %v990_v25  ;;  %v1056_v40 = vrot.slane %v1039_v33, %v3159_v30  ;;  %v1052_v41 = vrot.slane %v1039_v33, %v3161_v31  ;;  %v867_v31 = vrot.slane %v3179_v52, %v3159_v30 }
 0x4d9   :  { %v1035_v34 = vpack.c.bf16 %v1021_v29, %v1021_v29  ;;  %v1034_v35 = vpack.c.bf16 %v1017_v32, %v1017_v32  ;;  %v1062_v38 = vpack.c.bf16 %v1048_v36, %v1048_v36  ;;  %v1061_v39 = vpack.c.bf16 %v1044_v37, %v1044_v37 }
 0x4da   :  { %1129 = vrot.lane.b32.xlu1 %v983_v54, %s2890_s26  ;;  %1127 = vrot.lane.b32.xlu0 %v982_v55, %s2890_s26  ;;  %v1064_v42 = vpack.c.bf16 %v1056_v40, %v1056_v40  ;;  %v1063_v43 = vpack.c.bf16 %v1052_v41, %v1052_v41 }
 0x4de   :  { %1147 = vrot.lane.b32.xlu1 %v1010_v1, %s2891_s27  ;;  %1145 = vrot.lane.b32.xlu0 %v1009_v2, %s2891_s27  ;;  %v875_v1 = vpack.c.bf16 %v867_v31, %v867_v31 }
 0x4e2   :  { %1165 = vrot.lane.b32.xlu1 %v1037_v6, %s2892_s14  ;;  %1163 = vrot.lane.b32.xlu0 %v1036_v7, %s2892_s14 }
 0x4e6   :  { %1071 = vrot.lane.b32.xlu1 %v900_v10, %s2887_s29  ;;  %1069 = vrot.lane.b32.xlu0 %v899_v11, %s2887_s29 }
 0x4ea   :  { %1089 = vrot.lane.b32.xlu1 %v927_v14, %s2888_s24  ;;  %1087 = vrot.lane.b32.xlu0 %v926_v15, %s2888_s24 }
 0x4ee   :  { %1107 = vrot.lane.b32.xlu1 %v954_v18, %s2889_s25  ;;  %1105 = vrot.lane.b32.xlu0 %v953_v19, %s2889_s25 }
 0x4f2   :  { %1125 = vrot.lane.b32.xlu1 %v981_v22, %s2890_s26  ;;  %1123 = vrot.lane.b32.xlu0 %v980_v23, %s2890_s26 }
 0x4f6   :  { %1143 = vrot.lane.b32.xlu1 %v1008_v26, %s2891_s27  ;;  %1141 = vrot.lane.b32.xlu0 %v1007_v28, %s2891_s27 }
 0x4fa   :  { %1161 = vrot.lane.b32.xlu1 %v1035_v34, %s2892_s14  ;;  %1159 = vrot.lane.b32.xlu0 %v1034_v35, %s2892_s14 }
 0x4fe   :  { %1179 = vrot.lane.b32.xlu1 %v1062_v38, %s2893_s19  ;;  %1177 = vrot.lane.b32.xlu0 %v1061_v39, %s2893_s19 }
 0x502   :  { %1183 = vrot.lane.b32.xlu1 %v1064_v42, %s2893_s19  ;;  %1181 = vrot.lane.b32.xlu0 %v1063_v43, %s2893_s19 }
 0x540   :  { %v1076_v44 = vpop.permute.xlu1 %1075  ;;  %v1074_v45 = vpop.permute.xlu0 %1073 }
 0x541   :  { %v1080_v8 = vsel %vm848_vm5, %v1074_v45, %v1076_v44 }
 0x544   :  { %v1094_v46 = vpop.permute.xlu1 %1093  ;;  %v1092_v47 = vpop.permute.xlu0 %1091 }
 0x545   :  { %v1098_v12 = vsel %vm1095_vm6, %v1092_v47, %v1094_v46 }
 0x548   :  { %v1112_v49 = vpop.permute.xlu1 %1111  ;;  %v1110_v50 = vpop.permute.xlu0 %1109 }
 0x549   :  { %v1116_v18 = vsel %vm1113_vm7, %v1110_v50, %v1112_v49 }
 0x54c   :  { %v1130_v53 = vpop.permute.xlu1 %1129  ;;  %v1128_v54 = vpop.permute.xlu0 %1127 }
 0x54d   :  { %v1134_v24 = vsel %vm516_vm10, %v1128_v54, %v1130_v53 }
 0x550   :  { %v1148_v55 = vpop.permute.xlu1 %1147  ;;  %v1146_v57 = vpop.permute.xlu0 %1145 }
 0x551   :  { %v1152_v33 = vsel %vm1149_vm8, %v1146_v57, %v1148_v55 }
 0x554   :  { %v1166_v58 = vpop.permute.xlu1 %1165  ;;  %v1164_v61 = vpop.permute.xlu0 %1163 }
 0x555   :  { %v1170_v39 = vsel %vm1167_vm9, %v1164_v61, %v1166_v58 }
 0x558   :  { %v1072_v2 = vpop.permute.xlu1 %1071  ;;  %v1070_v3 = vpop.permute.xlu0 %1069 }
 0x559   :  { %v3242_v5 = vsel %vm848_vm5, %v1072_v2, %v1074_v45  ;;  %v3245_v6 = vsel %vm848_vm5, %v1070_v3, %v1072_v2  ;;  %v3248_v7 = vsel %vm848_vm5, %v875_v1, %v1070_v3 }
 0x55c   :  { %v1090_v9 = vpop.permute.xlu1 %1089  ;;  %v1088_v10 = vpop.permute.xlu0 %1087 }
 0x55d   :  { %v3251_v30 = vsel %vm1095_vm6, %v1090_v9, %v1092_v47  ;;  %v3253_v52 = vsel %vm1095_vm6, %v1088_v10, %v1090_v9  ;;  %v3255_v11 = vsel %vm1095_vm6, %v1080_v8, %v1088_v10 }
 0x560   :  { %v1108_v13 = vpop.permute.xlu1 %1107  ;;  %v1106_v14 = vpop.permute.xlu0 %1105 }
 0x561   :  { %v1115_v15 = vsel %vm1113_vm7, %v1108_v13, %v1110_v50  ;;  %v3257_v16 = vsel %vm1113_vm7, %v1106_v14, %v1108_v13  ;;  %v3259_v17 = vsel %vm1113_vm7, %v1098_v12, %v1106_v14 }
 0x564   :  { %v1126_v19 = vpop.permute.xlu1 %1125  ;;  %v1124_v20 = vpop.permute.xlu0 %1123 }
 0x565   :  { %v3262_v21 = vsel %vm516_vm10, %v1126_v19, %v1128_v54  ;;  %v3265_v22 = vsel %vm516_vm10, %v1124_v20, %v1126_v19  ;;  %v3268_v23 = vsel %vm516_vm10, %v1116_v18, %v1124_v20  ;;  %vm1185_vm10 = vcmask 457728  }
 0x568   :  { %v1144_v25 = vpop.permute.xlu1 %1143  ;;  %v1142_v26 = vpop.permute.xlu0 %1141 }
 0x569   :  { %v3271_v28 = vsel %vm1149_vm8, %v1144_v25, %v1146_v57  ;;  %v3273_v29 = vsel %vm1149_vm8, %v1142_v26, %v1144_v25  ;;  %v3275_v32 = vsel %vm1149_vm8, %v1134_v24, %v1142_v26 }
 0x56c   :  { %v1162_v34 = vpop.permute.xlu1 %1161  ;;  %v1160_v35 = vpop.permute.xlu0 %1159 }
 0x56d   :  { %v3277_v36 = vsel %vm1167_vm9, %v1162_v34, %v1164_v61  ;;  %v3279_v37 = vsel %vm1167_vm9, %v1160_v35, %v1162_v34  ;;  %v3281_v38 = vsel %vm1167_vm9, %v1152_v33, %v1160_v35 }
 0x570   :  { %v1180_v40 = vpop.permute.xlu1 %1179  ;;  %v1178_v41 = vpop.permute.xlu0 %1177 }
 0x571   :  { %v3283_v42 = vsel %vm1185_vm10, %v1178_v41, %v1180_v40  ;;  %v3285_v43 = vsel %vm1185_vm10, %v1170_v39, %v1178_v41 }
 0x574   :  { %v1184_v44 = vpop.permute.xlu1 %1183  ;;  %v1182_v45 = vpop.permute.xlu0 %1181 }
 0x575   :  { %v3287_v46 = vsel %vm1185_vm10, %v1180_v40, %v1182_v45  ;;  %v3289_v47 = vsel %vm1185_vm10, %v1182_v45, %v1184_v44 }
 0x576   :  { %2854 = dma.done.wait [#allocation4], 50176 }
 0x577   :  { %2855 = vsyncadd [#allocation4], 4294917120  ;;  %1668 = vmatprep.mubr.bf16.mxu0 %v873_v63  ;;  %1873 = vmatprep.mubr.bf16.mxu1 %v1115_v15  ;;  %v1229_v49 = vld [vmem:[#allocation3 + $0x8] sm:$0xff]  ;;  %v1228_v53 = vld [vmem:[#allocation3] sm:$0xff]  ;;  %vm1632_vm11 = vcmask 523264   ;;  %vm2346_vm13 = vcmask 1040384  }
 0x578   :  { %v1389_v50 = vld [vmem:[#allocation3 + $0x508] sm:$0xff]  ;;  %1636 = vmatprep.subr.bf16.mxu0 %v1229_v49  ;;  %v1388_v54 = vld [vmem:[#allocation3 + $0x500] sm:$0xff]  ;;  %v1231_v55 = vld [vmem:[#allocation3 + $0x18] sm:$0xff] }
 0x579   :  { %1841 = vmatprep.subr.bf16.mxu1 %v1389_v50  ;;  %v1391_v57 = vld [vmem:[#allocation3 + $0x518] sm:$0xff]  ;;  %1637 = vmatpush1.bf16.msra.mxu0 %v1228_v53  ;;  %v1230_v31 = vld [vmem:[#allocation3 + $0x10] sm:$0xff]  ;;  %v1233_v61 = vld [vmem:[#allocation3 + $0x28] sm:$0xff] }
 0x57a   :  { %1842 = vmatpush1.bf16.msra.mxu1 %v1388_v54  ;;  %1638 = vmatprep.subr.bf16.mxu0 %v1231_v55  ;;  %v1390_v58 = vld [vmem:[#allocation3 + $0x510] sm:$0xff]  ;;  %v1393_v1 = vld [vmem:[#allocation3 + $0x528] sm:$0xff]  ;;  %v1232_v59 = vld [vmem:[#allocation3 + $0x20] sm:$0xff] }
 0x57b   :  { %1843 = vmatprep.subr.bf16.mxu1 %v1391_v57  ;;  %v1392_v63 = vld [vmem:[#allocation3 + $0x520] sm:$0xff]  ;;  %v1235_v2 = vld [vmem:[#allocation3 + $0x38] sm:$0xff]  ;;  %v1234_v8 = vld [vmem:[#allocation3 + $0x30] sm:$0xff] }
 0x57c   :  { %v1395_v3 = vld [vmem:[#allocation3 + $0x538] sm:$0xff]  ;;  %v1394_v9 = vld [vmem:[#allocation3 + $0x530] sm:$0xff]  ;;  %v1237_v10 = vld [vmem:[#allocation3 + $0x48] sm:$0xff] }
 0x57d   :  { %1639 = vmatpush1.bf16.msra.mxu0 %v1230_v31  ;;  %v1397_v12 = vld [vmem:[#allocation3 + $0x548] sm:$0xff]  ;;  %v1236_v13 = vld [vmem:[#allocation3 + $0x40] sm:$0xff]  ;;  %v1239_v15 = vld [vmem:[#allocation3 + $0x58] sm:$0xff] }
 0x57e   :  { %1844 = vmatpush1.bf16.msra.mxu1 %v1390_v58  ;;  %1640 = vmatprep.subr.bf16.mxu0 %v1233_v61  ;;  %v1396_v14 = vld [vmem:[#allocation3 + $0x540] sm:$0xff]  ;;  %v1399_v18 = vld [vmem:[#allocation3 + $0x558] sm:$0xff]  ;;  %v1238_v19 = vld [vmem:[#allocation3 + $0x50] sm:$0xff] }
 0x57f   :  { %1845 = vmatprep.subr.bf16.mxu1 %v1393_v1  ;;  %v1398_v20 = vld [vmem:[#allocation3 + $0x550] sm:$0xff]  ;;  %v1241_v24 = vld [vmem:[#allocation3 + $0x68] sm:$0xff]  ;;  %v1240_v26 = vld [vmem:[#allocation3 + $0x60] sm:$0xff] }
 0x580   :  { %v1401_v25 = vld [vmem:[#allocation3 + $0x568] sm:$0xff]  ;;  %v1400_v33 = vld [vmem:[#allocation3 + $0x560] sm:$0xff]  ;;  %v1243_v34 = vld [vmem:[#allocation3 + $0x78] sm:$0xff] }
 0x581   :  { %1641 = vmatpush1.bf16.msra.mxu0 %v1232_v59  ;;  %v1403_v35 = vld [vmem:[#allocation3 + $0x578] sm:$0xff]  ;;  %v1242_v39 = vld [vmem:[#allocation3 + $0x70] sm:$0xff]  ;;  %v1245_v41 = vld [vmem:[#allocation3 + $0x88] sm:$0xff] }
 0x582   :  { %1846 = vmatpush1.bf16.msra.mxu1 %v1392_v63  ;;  %1642 = vmatprep.subr.bf16.mxu0 %v1235_v2  ;;  %v1402_v40 = vld [vmem:[#allocation3 + $0x570] sm:$0xff]  ;;  %v1405_v44 = vld [vmem:[#allocation3 + $0x588] sm:$0xff]  ;;  %v1244_v45 = vld [vmem:[#allocation3 + $0x80] sm:$0xff] }
 0x583   :  { %1847 = vmatprep.subr.bf16.mxu1 %v1395_v3  ;;  %v1404_v49 = vld [vmem:[#allocation3 + $0x580] sm:$0xff]  ;;  %v1247_v50 = vld [vmem:[#allocation3 + $0x98] sm:$0xff]  ;;  %v1246_v54 = vld [vmem:[#allocation3 + $0x90] sm:$0xff] }
 0x584   :  { %v1407_v53 = vld [vmem:[#allocation3 + $0x598] sm:$0xff]  ;;  %v1406_v55 = vld [vmem:[#allocation3 + $0x590] sm:$0xff]  ;;  %v1249_v57 = vld [vmem:[#allocation3 + $0xa8] sm:$0xff] }
 0x585   :  { %1643 = vmatpush1.bf16.msra.mxu0 %v1234_v8  ;;  %v1409_v31 = vld [vmem:[#allocation3 + $0x5a8] sm:$0xff]  ;;  %v1248_v58 = vld [vmem:[#allocation3 + $0xa0] sm:$0xff]  ;;  %v1251_v1 = vld [vmem:[#allocation3 + $0xb8] sm:$0xff] }
 0x586   :  { %1848 = vmatpush1.bf16.msra.mxu1 %v1394_v9  ;;  %1644 = vmatprep.subr.bf16.mxu0 %v1237_v10  ;;  %v1408_v61 = vld [vmem:[#allocation3 + $0x5a0] sm:$0xff]  ;;  %v1411_v59 = vld [vmem:[#allocation3 + $0x5b8] sm:$0xff]  ;;  %v1250_v63 = vld [vmem:[#allocation3 + $0xb0] sm:$0xff] }
 0x587   :  { %1849 = vmatprep.subr.bf16.mxu1 %v1397_v12  ;;  %v1410_v2 = vld [vmem:[#allocation3 + $0x5b0] sm:$0xff]  ;;  %v1253_v3 = vld [vmem:[#allocation3 + $0xc8] sm:$0xff]  ;;  %v1252_v9 = vld [vmem:[#allocation3 + $0xc0] sm:$0xff] }
 0x588   :  { %v1413_v8 = vld [vmem:[#allocation3 + $0x5c8] sm:$0xff]  ;;  %v1412_v10 = vld [vmem:[#allocation3 + $0x5c0] sm:$0xff]  ;;  %v1255_v12 = vld [vmem:[#allocation3 + $0xd8] sm:$0xff] }
 0x589   :  { %1645 = vmatpush1.bf16.msra.mxu0 %v1236_v13  ;;  %v1415_v13 = vld [vmem:[#allocation3 + $0x5d8] sm:$0xff]  ;;  %v1296_v60 = vld [vmem:[#allocation3 + $0x220] sm:$0xff] }
 0x58a   :  { %1850 = vmatpush1.bf16.msra.mxu1 %v1396_v14  ;;  %1646 = vmatprep.subr.bf16.mxu0 %v1239_v15  ;;  %v1254_v14 = vld [vmem:[#allocation3 + $0xd0] sm:$0xff]  ;;  %v1267_v56 = vld [vmem:[#allocation3 + $0x138] sm:$0xff] }
 0x58b   :  { %1851 = vmatprep.subr.bf16.mxu1 %v1399_v18  ;;  %v1414_v15 = vld [vmem:[#allocation3 + $0x5d0] sm:$0xff]  ;;  %v1257_v18 = vld [vmem:[#allocation3 + $0xe8] sm:$0xff] }
 0x58d   :  { %1647 = vmatpush1.bf16.msra.mxu0 %v1238_v19  ;;  %v1417_v19 = vld [vmem:[#allocation3 + $0x5e8] sm:$0xff] }
 0x58e   :  { %1852 = vmatpush1.bf16.msra.mxu1 %v1398_v20  ;;  %1648 = vmatprep.subr.bf16.mxu0 %v1241_v24  ;;  %v1256_v20 = vld [vmem:[#allocation3 + $0xe0] sm:$0xff] }
 0x58f   :  { %1853 = vmatprep.subr.bf16.mxu1 %v1401_v25  ;;  %v1416_v24 = vld [vmem:[#allocation3 + $0x5e0] sm:$0xff]  ;;  %v1259_v25 = vld [vmem:[#allocation3 + $0xf8] sm:$0xff] }
 0x591   :  { %1649 = vmatpush1.bf16.msra.mxu0 %v1240_v26  ;;  %v1419_v26 = vld [vmem:[#allocation3 + $0x5f8] sm:$0xff] }
 0x592   :  { %1854 = vmatpush1.bf16.msra.mxu1 %v1400_v33  ;;  %1650 = vmatprep.subr.bf16.mxu0 %v1243_v34  ;;  %v1258_v33 = vld [vmem:[#allocation3 + $0xf0] sm:$0xff] }
 0x593   :  { %1855 = vmatprep.subr.bf16.mxu1 %v1403_v35  ;;  %v1418_v34 = vld [vmem:[#allocation3 + $0x5f0] sm:$0xff]  ;;  %v1261_v35 = vld [vmem:[#allocation3 + $0x108] sm:$0xff] }
 0x595   :  { %1651 = vmatpush1.bf16.msra.mxu0 %v1242_v39  ;;  %v1421_v39 = vld [vmem:[#allocation3 + $0x608] sm:$0xff] }
 0x596   :  { %1856 = vmatpush1.bf16.msra.mxu1 %v1402_v40  ;;  %1652 = vmatprep.subr.bf16.mxu0 %v1245_v41  ;;  %v1260_v40 = vld [vmem:[#allocation3 + $0x100] sm:$0xff] }
 0x597   :  { %1857 = vmatprep.subr.bf16.mxu1 %v1405_v44  ;;  %v1420_v41 = vld [vmem:[#allocation3 + $0x600] sm:$0xff]  ;;  %v1263_v44 = vld [vmem:[#allocation3 + $0x118] sm:$0xff] }
 0x599   :  { %1653 = vmatpush1.bf16.msra.mxu0 %v1244_v45  ;;  %v1423_v45 = vld [vmem:[#allocation3 + $0x618] sm:$0xff] }
 0x59a   :  { %1858 = vmatpush1.bf16.msra.mxu1 %v1404_v49  ;;  %1654 = vmatprep.subr.bf16.mxu0 %v1247_v50  ;;  %v1262_v49 = vld [vmem:[#allocation3 + $0x110] sm:$0xff] }
 0x59b   :  { %1859 = vmatprep.subr.bf16.mxu1 %v1407_v53  ;;  %v1422_v50 = vld [vmem:[#allocation3 + $0x610] sm:$0xff]  ;;  %v1265_v53 = vld [vmem:[#allocation3 + $0x128] sm:$0xff] }
 0x59d   :  { %1655 = vmatpush1.bf16.msra.mxu0 %v1246_v54  ;;  %v1425_v54 = vld [vmem:[#allocation3 + $0x628] sm:$0xff] }
 0x59e   :  { %1860 = vmatpush1.bf16.msra.mxu1 %v1406_v55  ;;  %1656 = vmatprep.subr.bf16.mxu0 %v1249_v57  ;;  %v1264_v55 = vld [vmem:[#allocation3 + $0x120] sm:$0xff] }
 0x59f   :  { %1861 = vmatprep.subr.bf16.mxu1 %v1409_v31  ;;  %v1424_v57 = vld [vmem:[#allocation3 + $0x620] sm:$0xff]  ;;  %v1426_v31 = vld [vmem:[#allocation3 + $0x630] sm:$0xff] }
 0x5a1   :  { %1657 = vmatpush1.bf16.msra.mxu0 %v1248_v58  ;;  %v1269_v58 = vld [vmem:[#allocation3 + $0x148] sm:$0xff] }
 0x5a2   :  { %1862 = vmatpush1.bf16.msra.mxu1 %v1408_v61  ;;  %1658 = vmatprep.subr.bf16.mxu0 %v1251_v1  ;;  %v1429_v61 = vld [vmem:[#allocation3 + $0x648] sm:$0xff]  ;;  %v1268_v1 = vld [vmem:[#allocation3 + $0x140] sm:$0xff] }
 0x5a3   :  { %1863 = vmatprep.subr.bf16.mxu1 %v1411_v59  ;;  %v1431_v59 = vld [vmem:[#allocation3 + $0x658] sm:$0xff] }
 0x5a5   :  { %1659 = vmatpush1.bf16.msra.mxu0 %v1250_v63  ;;  %v1270_v63 = vld [vmem:[#allocation3 + $0x150] sm:$0xff] }
 0x5a6   :  { %1864 = vmatpush1.bf16.msra.mxu1 %v1410_v2  ;;  %1660 = vmatprep.subr.bf16.mxu0 %v1253_v3  ;;  %v1430_v2 = vld [vmem:[#allocation3 + $0x650] sm:$0xff]  ;;  %v1273_v3 = vld [vmem:[#allocation3 + $0x168] sm:$0xff] }
 0x5a7   :  { %1865 = vmatprep.subr.bf16.mxu1 %v1413_v8  ;;  %v1433_v8 = vld [vmem:[#allocation3 + $0x668] sm:$0xff] }
 0x5a9   :  { %1661 = vmatpush1.bf16.msra.mxu0 %v1252_v9  ;;  %v1272_v9 = vld [vmem:[#allocation3 + $0x160] sm:$0xff] }
 0x5aa   :  { %1866 = vmatpush1.bf16.msra.mxu1 %v1412_v10  ;;  %1662 = vmatprep.subr.bf16.mxu0 %v1255_v12  ;;  %v1432_v10 = vld [vmem:[#allocation3 + $0x660] sm:$0xff]  ;;  %v1275_v12 = vld [vmem:[#allocation3 + $0x178] sm:$0xff] }
 0x5ab   :  { %1867 = vmatprep.subr.bf16.mxu1 %v1415_v13  ;;  %v1435_v13 = vld [vmem:[#allocation3 + $0x678] sm:$0xff] }
 0x5ad   :  { %1663 = vmatpush1.bf16.msra.mxu0 %v1254_v14  ;;  %v1274_v14 = vld [vmem:[#allocation3 + $0x170] sm:$0xff] }
 0x5ae   :  { %1868 = vmatpush1.bf16.msra.mxu1 %v1414_v15  ;;  %1664 = vmatprep.subr.bf16.mxu0 %v1257_v18  ;;  %v1434_v15 = vld [vmem:[#allocation3 + $0x670] sm:$0xff]  ;;  %v1277_v18 = vld [vmem:[#allocation3 + $0x188] sm:$0xff] }
 0x5af   :  { %1869 = vmatprep.subr.bf16.mxu1 %v1417_v19  ;;  %v1437_v19 = vld [vmem:[#allocation3 + $0x688] sm:$0xff] }
 0x5b1   :  { %1665 = vmatpush1.bf16.msra.mxu0 %v1256_v20  ;;  %v1276_v20 = vld [vmem:[#allocation3 + $0x180] sm:$0xff] }
 0x5b2   :  { %1870 = vmatpush1.bf16.msra.mxu1 %v1416_v24  ;;  %1666 = vmatprep.subr.bf16.mxu0 %v1259_v25  ;;  %v1436_v24 = vld [vmem:[#allocation3 + $0x680] sm:$0xff]  ;;  %v1279_v25 = vld [vmem:[#allocation3 + $0x198] sm:$0xff] }
 0x5b3   :  { %1871 = vmatprep.subr.bf16.mxu1 %v1419_v26  ;;  %v1439_v26 = vld [vmem:[#allocation3 + $0x698] sm:$0xff] }
 0x5b5   :  { %1667 = vmatpush1.bf16.msra.mxu0 %v1258_v33  ;;  %v1278_v33 = vld [vmem:[#allocation3 + $0x190] sm:$0xff] }
 0x5b6   :  { %1872 = vmatpush1.bf16.msra.mxu1 %v1418_v34  ;;  %1677 = vmatprep.subr.bf16.mxu0 %v1261_v35  ;;  %v1438_v34 = vld [vmem:[#allocation3 + $0x690] sm:$0xff]  ;;  %v1281_v35 = vld [vmem:[#allocation3 + $0x1a8] sm:$0xff] }
 0x5b7   :  { %1882 = vmatprep.subr.bf16.mxu1 %v1421_v39  ;;  %v1441_v39 = vld [vmem:[#allocation3 + $0x6a8] sm:$0xff] }
 0x5b8   :  { %1669 = vmatmul.mubr.bf16.vlgmr.msra.gmra.mrb[36].mxu0 %v872_v62  ;;  %v1427_v62 = vld [vmem:[#allocation3 + $0x638] sm:$0xff] }
 0x5b9   :  { %1874 = vmatmul.mubr.bf16.vlgmr.msra.gmra.mrb[0].mxu1 %v3257_v16  ;;  %1678 = vmatpush1.bf16.msra.mxu0 %v1260_v40  ;;  %v1266_v16 = vld [vmem:[#allocation3 + $0x130] sm:$0xff]  ;;  %v1280_v40 = vld [vmem:[#allocation3 + $0x1a0] sm:$0xff] }
 0x5ba   :  { %1883 = vmatpush1.bf16.msra.mxu1 %v1420_v41  ;;  %1679 = vmatprep.subr.bf16.mxu0 %v1263_v44  ;;  %v1440_v41 = vld [vmem:[#allocation3 + $0x6a0] sm:$0xff]  ;;  %v1283_v44 = vld [vmem:[#allocation3 + $0x1b8] sm:$0xff] }
 0x5bb   :  { %1884 = vmatprep.subr.bf16.mxu1 %v1423_v45  ;;  %1709 = vmatprep.mubr.bf16.mxu0 %v3248_v7  ;;  %v1428_v7 = vld [vmem:[#allocation3 + $0x640] sm:$0xff]  ;;  %v1443_v45 = vld [vmem:[#allocation3 + $0x6b8] sm:$0xff] }
 0x5bc   :  { %1914 = vmatprep.mubr.bf16.mxu1 %v3265_v22  ;;  %v1271_v22 = vld [vmem:[#allocation3 + $0x158] sm:$0xff] }
 0x5bd   :  { %1680 = vmatpush1.bf16.msra.mxu0 %v1262_v49  ;;  %v1282_v49 = vld [vmem:[#allocation3 + $0x1b0] sm:$0xff] }
 0x5be   :  { %1885 = vmatpush1.bf16.msra.mxu1 %v1422_v50  ;;  %1681 = vmatprep.subr.bf16.mxu0 %v1265_v53  ;;  %v1442_v50 = vld [vmem:[#allocation3 + $0x6b0] sm:$0xff]  ;;  %v1285_v53 = vld [vmem:[#allocation3 + $0x1c8] sm:$0xff] }
 0x5bf   :  { %1886 = vmatprep.subr.bf16.mxu1 %v1425_v54  ;;  %v1445_v54 = vld [vmem:[#allocation3 + $0x6c8] sm:$0xff] }
 0x5c1   :  { %1682 = vmatpush1.bf16.msra.mxu0 %v1264_v55  ;;  %v1284_v55 = vld [vmem:[#allocation3 + $0x1c0] sm:$0xff] }
 0x5c2   :  { %1887 = vmatpush1.bf16.msra.mxu1 %v1424_v57  ;;  %1683 = vmatprep.subr.bf16.mxu0 %v1267_v56  ;;  %v1444_v57 = vld [vmem:[#allocation3 + $0x6c0] sm:$0xff]  ;;  %v1287_v56 = vld [vmem:[#allocation3 + $0x1d8] sm:$0xff] }
 0x5c3   :  { %1888 = vmatprep.subr.bf16.mxu1 %v1427_v62  ;;  %v1447_v62 = vld [vmem:[#allocation3 + $0x6d8] sm:$0xff] }
 0x5c5   :  { %1684 = vmatpush1.bf16.msra.mxu0 %v1266_v16  ;;  %v1286_v16 = vld [vmem:[#allocation3 + $0x1d0] sm:$0xff] }
 0x5c6   :  { %1889 = vmatpush1.bf16.msra.mxu1 %v1426_v31  ;;  %1685 = vmatprep.subr.bf16.mxu0 %v1269_v58  ;;  %v1446_v31 = vld [vmem:[#allocation3 + $0x6d0] sm:$0xff]  ;;  %v1289_v58 = vld [vmem:[#allocation3 + $0x1e8] sm:$0xff] }
 0x5c7   :  { %1890 = vmatprep.subr.bf16.mxu1 %v1429_v61  ;;  %v1449_v61 = vld [vmem:[#allocation3 + $0x6e8] sm:$0xff] }
 0x5c9   :  { %1686 = vmatpush1.bf16.msra.mxu0 %v1268_v1  ;;  %v1288_v1 = vld [vmem:[#allocation3 + $0x1e0] sm:$0xff] }
 0x5ca   :  { %1891 = vmatpush1.bf16.msra.mxu1 %v1428_v7  ;;  %1687 = vmatprep.subr.bf16.mxu0 %v1271_v22  ;;  %v1448_v7 = vld [vmem:[#allocation3 + $0x6e0] sm:$0xff]  ;;  %v1291_v22 = vld [vmem:[#allocation3 + $0x1f8] sm:$0xff] }
 0x5cb   :  { %1892 = vmatprep.subr.bf16.mxu1 %v1431_v59  ;;  %v1451_v59 = vld [vmem:[#allocation3 + $0x6f8] sm:$0xff] }
 0x5cd   :  { %1688 = vmatpush1.bf16.msra.mxu0 %v1270_v63  ;;  %v1290_v63 = vld [vmem:[#allocation3 + $0x1f0] sm:$0xff] }
 0x5ce   :  { %1893 = vmatpush1.bf16.msra.mxu1 %v1430_v2  ;;  %1689 = vmatprep.subr.bf16.mxu0 %v1273_v3  ;;  %v1450_v2 = vld [vmem:[#allocation3 + $0x6f0] sm:$0xff]  ;;  %v1293_v3 = vld [vmem:[#allocation3 + $0x208] sm:$0xff] }
 0x5cf   :  { %1894 = vmatprep.subr.bf16.mxu1 %v1433_v8  ;;  %v1453_v8 = vld [vmem:[#allocation3 + $0x708] sm:$0xff] }
 0x5d1   :  { %1690 = vmatpush1.bf16.msra.mxu0 %v1272_v9  ;;  %v1292_v9 = vld [vmem:[#allocation3 + $0x200] sm:$0xff] }
 0x5d2   :  { %1895 = vmatpush1.bf16.msra.mxu1 %v1432_v10  ;;  %1691 = vmatprep.subr.bf16.mxu0 %v1275_v12  ;;  %v1452_v10 = vld [vmem:[#allocation3 + $0x700] sm:$0xff]  ;;  %v1295_v12 = vld [vmem:[#allocation3 + $0x218] sm:$0xff] }
 0x5d3   :  { %1896 = vmatprep.subr.bf16.mxu1 %v1435_v13  ;;  %v1455_v13 = vld [vmem:[#allocation3 + $0x718] sm:$0xff] }
 0x5d5   :  { %1692 = vmatpush1.bf16.msra.mxu0 %v1274_v14  ;;  %v1294_v14 = vld [vmem:[#allocation3 + $0x210] sm:$0xff] }
 0x5d6   :  { %1897 = vmatpush1.bf16.msra.mxu1 %v1434_v15  ;;  %1693 = vmatprep.subr.bf16.mxu0 %v1277_v18  ;;  %v1454_v15 = vld [vmem:[#allocation3 + $0x710] sm:$0xff]  ;;  %v1297_v18 = vld [vmem:[#allocation3 + $0x228] sm:$0xff] }
 0x5d7   :  { %1898 = vmatprep.subr.bf16.mxu1 %v1437_v19  ;;  %v1457_v19 = vld [vmem:[#allocation3 + $0x728] sm:$0xff] }
 0x5d9   :  { %1694 = vmatpush1.bf16.msra.mxu0 %v1276_v20  ;;  %v1299_v20 = vld [vmem:[#allocation3 + $0x238] sm:$0xff] }
 0x5da   :  { %1899 = vmatpush1.bf16.msra.mxu1 %v1436_v24  ;;  %1695 = vmatprep.subr.bf16.mxu0 %v1279_v25  ;;  %v1298_v24 = vld [vmem:[#allocation3 + $0x230] sm:$0xff] }
 0x5db   :  { %1900 = vmatprep.subr.bf16.mxu1 %v1439_v26  ;;  %v1458_v25 = vld [vmem:[#allocation3 + $0x730] sm:$0xff]  ;;  %v1301_v26 = vld [vmem:[#allocation3 + $0x248] sm:$0xff] }
 0x5dd   :  { %1696 = vmatpush1.bf16.msra.mxu0 %v1278_v33  ;;  %v1461_v33 = vld [vmem:[#allocation3 + $0x748] sm:$0xff] }
 0x5de   :  { %1901 = vmatpush1.bf16.msra.mxu1 %v1438_v34  ;;  %1697 = vmatprep.subr.bf16.mxu0 %v1281_v35  ;;  %v1303_v34 = vld [vmem:[#allocation3 + $0x258] sm:$0xff] }
 0x5df   :  { %1902 = vmatprep.subr.bf16.mxu1 %v1441_v39  ;;  %v1463_v35 = vld [vmem:[#allocation3 + $0x758] sm:$0xff]  ;;  %v1302_v39 = vld [vmem:[#allocation3 + $0x250] sm:$0xff] }
 0x5e1   :  { %1698 = vmatpush1.bf16.msra.mxu0 %v1280_v40  ;;  %v1462_v40 = vld [vmem:[#allocation3 + $0x750] sm:$0xff] }
 0x5e2   :  { %1903 = vmatpush1.bf16.msra.mxu1 %v1440_v41  ;;  %1699 = vmatprep.subr.bf16.mxu0 %v1283_v44  ;;  %v1305_v41 = vld [vmem:[#allocation3 + $0x268] sm:$0xff] }
 0x5e3   :  { %1904 = vmatprep.subr.bf16.mxu1 %v1443_v45  ;;  %v1465_v44 = vld [vmem:[#allocation3 + $0x768] sm:$0xff]  ;;  %v1304_v45 = vld [vmem:[#allocation3 + $0x260] sm:$0xff] }
 0x5e5   :  { %1700 = vmatpush1.bf16.msra.mxu0 %v1282_v49  ;;  %v1464_v49 = vld [vmem:[#allocation3 + $0x760] sm:$0xff] }
 0x5e6   :  { %1905 = vmatpush1.bf16.msra.mxu1 %v1442_v50  ;;  %1701 = vmatprep.subr.bf16.mxu0 %v1285_v53  ;;  %v1307_v50 = vld [vmem:[#allocation3 + $0x278] sm:$0xff] }
 0x5e7   :  { %1906 = vmatprep.subr.bf16.mxu1 %v1445_v54  ;;  %v1467_v53 = vld [vmem:[#allocation3 + $0x778] sm:$0xff]  ;;  %v1306_v54 = vld [vmem:[#allocation3 + $0x270] sm:$0xff] }
 0x5e9   :  { %1702 = vmatpush1.bf16.msra.mxu0 %v1284_v55  ;;  %v1466_v55 = vld [vmem:[#allocation3 + $0x770] sm:$0xff] }
 0x5ea   :  { %1907 = vmatpush1.bf16.msra.mxu1 %v1444_v57  ;;  %1703 = vmatprep.subr.bf16.mxu0 %v1287_v56  ;;  %v1309_v57 = vld [vmem:[#allocation3 + $0x288] sm:$0xff] }
 0x5eb   :  { %1908 = vmatprep.subr.bf16.mxu1 %v1447_v62  ;;  %v1469_v56 = vld [vmem:[#allocation3 + $0x788] sm:$0xff]  ;;  %v1308_v62 = vld [vmem:[#allocation3 + $0x280] sm:$0xff] }
 0x5ed   :  { %1704 = vmatpush1.bf16.msra.mxu0 %v1286_v16  ;;  %v1468_v16 = vld [vmem:[#allocation3 + $0x780] sm:$0xff] }
 0x5ee   :  { %1909 = vmatpush1.bf16.msra.mxu1 %v1446_v31  ;;  %1705 = vmatprep.subr.bf16.mxu0 %v1289_v58  ;;  %v1311_v31 = vld [vmem:[#allocation3 + $0x298] sm:$0xff] }
 0x5ef   :  { %1910 = vmatprep.subr.bf16.mxu1 %v1449_v61  ;;  %v1471_v58 = vld [vmem:[#allocation3 + $0x798] sm:$0xff]  ;;  %v1310_v61 = vld [vmem:[#allocation3 + $0x290] sm:$0xff] }
 0x5f1   :  { %1706 = vmatpush1.bf16.msra.mxu0 %v1288_v1  ;;  %v1470_v1 = vld [vmem:[#allocation3 + $0x790] sm:$0xff] }
 0x5f2   :  { %1911 = vmatpush1.bf16.msra.mxu1 %v1448_v7  ;;  %1707 = vmatprep.subr.bf16.mxu0 %v1291_v22  ;;  %v1313_v7 = vld [vmem:[#allocation3 + $0x2a8] sm:$0xff] }
 0x5f3   :  { %1912 = vmatprep.subr.bf16.mxu1 %v1451_v59  ;;  %v1473_v22 = vld [vmem:[#allocation3 + $0x7a8] sm:$0xff]  ;;  %v1312_v59 = vld [vmem:[#allocation3 + $0x2a0] sm:$0xff] }
 0x5f5   :  { %1708 = vmatpush1.bf16.msra.mxu0 %v1290_v63  ;;  %v1472_v63 = vld [vmem:[#allocation3 + $0x7a0] sm:$0xff] }
 0x5f6   :  { %1913 = vmatpush1.bf16.msra.mxu1 %v1450_v2  ;;  %1718 = vmatprep.subr.bf16.mxu0 %v1293_v3  ;;  %v1315_v2 = vld [vmem:[#allocation3 + $0x2b8] sm:$0xff] }
 0x5f7   :  { %1923 = vmatprep.subr.bf16.mxu1 %v1453_v8  ;;  %v1475_v3 = vld [vmem:[#allocation3 + $0x7b8] sm:$0xff]  ;;  %v1314_v8 = vld [vmem:[#allocation3 + $0x2b0] sm:$0xff] }
 0x5f8   :  { %1710 = vmatmul.mubr.bf16.vlgmr.msra.gmra.mrb[36].mxu0 %v874_v0  ;;  %v1456_v0 = vld [vmem:[#allocation3 + $0x720] sm:$0xff] }
 0x5f9   :  { %1915 = vmatmul.mubr.bf16.vlgmr.msra.gmra.mrb[0].mxu1 %v3268_v23  ;;  %1719 = vmatpush1.bf16.msra.mxu0 %v1292_v9  ;;  %v1459_v23 = vld [vmem:[#allocation3 + $0x738] sm:$0xff]  ;;  %v1474_v9 = vld [vmem:[#allocation3 + $0x7b0] sm:$0xff] }
 0x5fa   :  { %1924 = vmatpush1.bf16.msra.mxu1 %v1452_v10  ;;  %1720 = vmatprep.subr.bf16.mxu0 %v1295_v12  ;;  %v1317_v10 = vld [vmem:[#allocation3 + $0x2c8] sm:$0xff] }
 0x5fb   :  { %1925 = vmatprep.subr.bf16.mxu1 %v1455_v13  ;;  %1750 = vmatprep.mubr.bf16.mxu0 %v3242_v5  ;;  %v1300_v5 = vld [vmem:[#allocation3 + $0x240] sm:$0xff]  ;;  %v1477_v12 = vld [vmem:[#allocation3 + $0x7c8] sm:$0xff] }
 0x5fc   :  { %1955 = vmatprep.mubr.bf16.mxu1 %v3275_v32  ;;  %v1460_v32 = vld [vmem:[#allocation3 + $0x740] sm:$0xff] }
 0x5fd   :  { %1721 = vmatpush1.bf16.msra.mxu0 %v1294_v14  ;;  %v1316_v13 = vld [vmem:[#allocation3 + $0x2c0] sm:$0xff] }
 0x5fe   :  { %1926 = vmatpush1.bf16.msra.mxu1 %v1454_v15  ;;  %1722 = vmatprep.subr.bf16.mxu0 %v1297_v18  ;;  %v1476_v14 = vld [vmem:[#allocation3 + $0x7c0] sm:$0xff]  ;;  %v1319_v15 = vld [vmem:[#allocation3 + $0x2d8] sm:$0xff] }
 0x5ff   :  { %1927 = vmatprep.subr.bf16.mxu1 %v1457_v19  ;;  %v1479_v18 = vld [vmem:[#allocation3 + $0x7d8] sm:$0xff]  ;;  %v1318_v19 = vld [vmem:[#allocation3 + $0x2d0] sm:$0xff] }
 0x601   :  { %1723 = vmatpush1.bf16.msra.mxu0 %v1296_v60  ;;  %v1478_v60 = vld [vmem:[#allocation3 + $0x7d0] sm:$0xff] }
 0x602   :  { %1928 = vmatpush1.bf16.msra.mxu1 %v1456_v0  ;;  %1724 = vmatprep.subr.bf16.mxu0 %v1299_v20  ;;  %v1321_v0 = vld [vmem:[#allocation3 + $0x2e8] sm:$0xff] }
 0x603   :  { %1929 = vmatprep.subr.bf16.mxu1 %v1459_v23  ;;  %v1481_v20 = vld [vmem:[#allocation3 + $0x7e8] sm:$0xff]  ;;  %v1320_v23 = vld [vmem:[#allocation3 + $0x2e0] sm:$0xff] }
 0x605   :  { %1725 = vmatpush1.bf16.msra.mxu0 %v1298_v24  ;;  %v1480_v24 = vld [vmem:[#allocation3 + $0x7e0] sm:$0xff] }
 0x606   :  { %1930 = vmatpush1.bf16.msra.mxu1 %v1458_v25  ;;  %1726 = vmatprep.subr.bf16.mxu0 %v1301_v26  ;;  %v1323_v25 = vld [vmem:[#allocation3 + $0x2f8] sm:$0xff] }
 0x607   :  { %1931 = vmatprep.subr.bf16.mxu1 %v1461_v33  ;;  %v1483_v26 = vld [vmem:[#allocation3 + $0x7f8] sm:$0xff]  ;;  %v1322_v33 = vld [vmem:[#allocation3 + $0x2f0] sm:$0xff] }
 0x609   :  { %1727 = vmatpush1.bf16.msra.mxu0 %v1300_v5  ;;  %v1482_v5 = vld [vmem:[#allocation3 + $0x7f0] sm:$0xff] }
 0x60a   :  { %1932 = vmatpush1.bf16.msra.mxu1 %v1460_v32  ;;  %1728 = vmatprep.subr.bf16.mxu0 %v1303_v34  ;;  %v1325_v32 = vld [vmem:[#allocation3 + $0x308] sm:$0xff] }
 0x60b   :  { %1933 = vmatprep.subr.bf16.mxu1 %v1463_v35  ;;  %v1485_v34 = vld [vmem:[#allocation3 + $0x808] sm:$0xff]  ;;  %v1324_v35 = vld [vmem:[#allocation3 + $0x300] sm:$0xff] }
 0x60d   :  { %1729 = vmatpush1.bf16.msra.mxu0 %v1302_v39  ;;  %v1484_v39 = vld [vmem:[#allocation3 + $0x800] sm:$0xff] }
 0x60e   :  { %1934 = vmatpush1.bf16.msra.mxu1 %v1462_v40  ;;  %1730 = vmatprep.subr.bf16.mxu0 %v1305_v41  ;;  %v1327_v40 = vld [vmem:[#allocation3 + $0x318] sm:$0xff] }
 0x60f   :  { %1935 = vmatprep.subr.bf16.mxu1 %v1465_v44  ;;  %v1487_v41 = vld [vmem:[#allocation3 + $0x818] sm:$0xff]  ;;  %v1326_v44 = vld [vmem:[#allocation3 + $0x310] sm:$0xff] }
 0x611   :  { %1731 = vmatpush1.bf16.msra.mxu0 %v1304_v45  ;;  %v1486_v45 = vld [vmem:[#allocation3 + $0x810] sm:$0xff] }
 0x612   :  { %1936 = vmatpush1.bf16.msra.mxu1 %v1464_v49  ;;  %1732 = vmatprep.subr.bf16.mxu0 %v1307_v50  ;;  %v1329_v49 = vld [vmem:[#allocation3 + $0x328] sm:$0xff] }
 0x613   :  { %1937 = vmatprep.subr.bf16.mxu1 %v1467_v53  ;;  %v1489_v50 = vld [vmem:[#allocation3 + $0x828] sm:$0xff]  ;;  %v1328_v53 = vld [vmem:[#allocation3 + $0x320] sm:$0xff] }
 0x615   :  { %1733 = vmatpush1.bf16.msra.mxu0 %v1306_v54  ;;  %v1331_v54 = vld [vmem:[#allocation3 + $0x338] sm:$0xff] }
 0x616   :  { %1938 = vmatpush1.bf16.msra.mxu1 %v1466_v55  ;;  %1734 = vmatprep.subr.bf16.mxu0 %v1309_v57  ;;  %v1330_v55 = vld [vmem:[#allocation3 + $0x330] sm:$0xff] }
 0x617   :  { %1939 = vmatprep.subr.bf16.mxu1 %v1469_v56  ;;  %v1490_v57 = vld [vmem:[#allocation3 + $0x830] sm:$0xff]  ;;  %v1333_v56 = vld [vmem:[#allocation3 + $0x348] sm:$0xff] }
 0x619   :  { %1735 = vmatpush1.bf16.msra.mxu0 %v1308_v62  ;;  %v1493_v62 = vld [vmem:[#allocation3 + $0x848] sm:$0xff] }
 0x61a   :  { %1940 = vmatpush1.bf16.msra.mxu1 %v1468_v16  ;;  %1736 = vmatprep.subr.bf16.mxu0 %v1311_v31  ;;  %v1335_v16 = vld [vmem:[#allocation3 + $0x358] sm:$0xff] }
 0x61b   :  { %1941 = vmatprep.subr.bf16.mxu1 %v1471_v58  ;;  %v1495_v31 = vld [vmem:[#allocation3 + $0x858] sm:$0xff]  ;;  %v1334_v58 = vld [vmem:[#allocation3 + $0x350] sm:$0xff] }
 0x61d   :  { %1737 = vmatpush1.bf16.msra.mxu0 %v1310_v61  ;;  %v1494_v61 = vld [vmem:[#allocation3 + $0x850] sm:$0xff] }
 0x61e   :  { %1942 = vmatpush1.bf16.msra.mxu1 %v1470_v1  ;;  %1738 = vmatprep.subr.bf16.mxu0 %v1313_v7  ;;  %v1337_v1 = vld [vmem:[#allocation3 + $0x368] sm:$0xff] }
 0x61f   :  { %1943 = vmatprep.subr.bf16.mxu1 %v1473_v22  ;;  %v1497_v7 = vld [vmem:[#allocation3 + $0x868] sm:$0xff]  ;;  %v1336_v22 = vld [vmem:[#allocation3 + $0x360] sm:$0xff] }
 0x621   :  { %1739 = vmatpush1.bf16.msra.mxu0 %v1312_v59  ;;  %v1496_v59 = vld [vmem:[#allocation3 + $0x860] sm:$0xff] }
 0x622   :  { %1944 = vmatpush1.bf16.msra.mxu1 %v1472_v63  ;;  %1740 = vmatprep.subr.bf16.mxu0 %v1315_v2  ;;  %v1339_v63 = vld [vmem:[#allocation3 + $0x378] sm:$0xff] }
 0x623   :  { %1945 = vmatprep.subr.bf16.mxu1 %v1475_v3  ;;  %v1499_v2 = vld [vmem:[#allocation3 + $0x878] sm:$0xff]  ;;  %v1338_v3 = vld [vmem:[#allocation3 + $0x370] sm:$0xff] }
 0x625   :  { %1741 = vmatpush1.bf16.msra.mxu0 %v1314_v8  ;;  %v1498_v8 = vld [vmem:[#allocation3 + $0x870] sm:$0xff] }
 0x626   :  { %1946 = vmatpush1.bf16.msra.mxu1 %v1474_v9  ;;  %1742 = vmatprep.subr.bf16.mxu0 %v1317_v10  ;;  %v1341_v9 = vld [vmem:[#allocation3 + $0x388] sm:$0xff] }
 0x627   :  { %1947 = vmatprep.subr.bf16.mxu1 %v1477_v12  ;;  %v1501_v10 = vld [vmem:[#allocation3 + $0x888] sm:$0xff]  ;;  %v1340_v12 = vld [vmem:[#allocation3 + $0x380] sm:$0xff] }
 0x629   :  { %1743 = vmatpush1.bf16.msra.mxu0 %v1316_v13  ;;  %v1500_v13 = vld [vmem:[#allocation3 + $0x880] sm:$0xff] }
 0x62a   :  { %1948 = vmatpush1.bf16.msra.mxu1 %v1476_v14  ;;  %1744 = vmatprep.subr.bf16.mxu0 %v1319_v15  ;;  %v1343_v14 = vld [vmem:[#allocation3 + $0x398] sm:$0xff] }
 0x62b   :  { %1949 = vmatprep.subr.bf16.mxu1 %v1479_v18  ;;  %v1503_v15 = vld [vmem:[#allocation3 + $0x898] sm:$0xff]  ;;  %v1342_v18 = vld [vmem:[#allocation3 + $0x390] sm:$0xff] }
 0x62d   :  { %1745 = vmatpush1.bf16.msra.mxu0 %v1318_v19  ;;  %v1502_v19 = vld [vmem:[#allocation3 + $0x890] sm:$0xff] }
 0x62e   :  { %1950 = vmatpush1.bf16.msra.mxu1 %v1478_v60  ;;  %1746 = vmatprep.subr.bf16.mxu0 %v1321_v0  ;;  %v1345_v60 = vld [vmem:[#allocation3 + $0x3a8] sm:$0xff] }
 0x62f   :  { %1951 = vmatprep.subr.bf16.mxu1 %v1481_v20  ;;  %v1505_v0 = vld [vmem:[#allocation3 + $0x8a8] sm:$0xff]  ;;  %v1344_v20 = vld [vmem:[#allocation3 + $0x3a0] sm:$0xff] }
 0x631   :  { %1747 = vmatpush1.bf16.msra.mxu0 %v1320_v23  ;;  %v1504_v23 = vld [vmem:[#allocation3 + $0x8a0] sm:$0xff] }
 0x632   :  { %1952 = vmatpush1.bf16.msra.mxu1 %v1480_v24  ;;  %1748 = vmatprep.subr.bf16.mxu0 %v1323_v25  ;;  %v1347_v24 = vld [vmem:[#allocation3 + $0x3b8] sm:$0xff] }
 0x633   :  { %1953 = vmatprep.subr.bf16.mxu1 %v1483_v26  ;;  %v1507_v25 = vld [vmem:[#allocation3 + $0x8b8] sm:$0xff]  ;;  %v1346_v26 = vld [vmem:[#allocation3 + $0x3b0] sm:$0xff] }
 0x635   :  { %1749 = vmatpush1.bf16.msra.mxu0 %v1322_v33  ;;  %v1506_v33 = vld [vmem:[#allocation3 + $0x8b0] sm:$0xff] }
 0x636   :  { %1954 = vmatpush1.bf16.msra.mxu1 %v1482_v5  ;;  %1759 = vmatprep.subr.bf16.mxu0 %v1325_v32  ;;  %v1349_v5 = vld [vmem:[#allocation3 + $0x3c8] sm:$0xff] }
 0x637   :  { %1964 = vmatprep.subr.bf16.mxu1 %v1485_v34  ;;  %v1509_v32 = vld [vmem:[#allocation3 + $0x8c8] sm:$0xff]  ;;  %v1348_v34 = vld [vmem:[#allocation3 + $0x3c0] sm:$0xff] }
 0x638   :  { %1751 = vmatmul.mubr.bf16.vlgmr.msra.gmra.mrb[36].mxu0 %v3245_v6  ;;  %v1488_v6 = vld [vmem:[#allocation3 + $0x820] sm:$0xff] }
 0x639   :  { %1956 = vmatmul.mubr.bf16.vlgmr.msra.gmra.mrb[0].mxu1 %v3262_v21  ;;  %1760 = vmatpush1.bf16.msra.mxu0 %v1324_v35  ;;  %v1491_v21 = vld [vmem:[#allocation3 + $0x838] sm:$0xff]  ;;  %v1508_v35 = vld [vmem:[#allocation3 + $0x8c0] sm:$0xff] }
 0x63a   :  { %1965 = vmatpush1.bf16.msra.mxu1 %v1484_v39  ;;  %1761 = vmatprep.subr.bf16.mxu0 %v1327_v40  ;;  %v1351_v39 = vld [vmem:[#allocation3 + $0x3d8] sm:$0xff] }
 0x63b   :  { %1966 = vmatprep.subr.bf16.mxu1 %v1487_v41  ;;  %1791 = vmatprep.mubr.bf16.mxu0 %v3253_v52  ;;  %v1332_v52 = vld [vmem:[#allocation3 + $0x340] sm:$0xff]  ;;  %v1511_v40 = vld [vmem:[#allocation3 + $0x8d8] sm:$0xff]  ;;  %v1350_v41 = vld [vmem:[#allocation3 + $0x3d0] sm:$0xff] }
 0x63c   :  { %1996 = vmatprep.mubr.bf16.mxu1 %v3271_v28  ;;  %v1492_v28 = vld [vmem:[#allocation3 + $0x840] sm:$0xff] }
 0x63d   :  { %1762 = vmatpush1.bf16.msra.mxu0 %v1326_v44  ;;  %v1510_v44 = vld [vmem:[#allocation3 + $0x8d0] sm:$0xff] }
 0x63e   :  { %1967 = vmatpush1.bf16.msra.mxu1 %v1486_v45  ;;  %1763 = vmatprep.subr.bf16.mxu0 %v1329_v49  ;;  %v1353_v45 = vld [vmem:[#allocation3 + $0x3e8] sm:$0xff] }
 0x63f   :  { %1968 = vmatprep.subr.bf16.mxu1 %v1489_v50  ;;  %v1513_v49 = vld [vmem:[#allocation3 + $0x8e8] sm:$0xff]  ;;  %v1352_v50 = vld [vmem:[#allocation3 + $0x3e0] sm:$0xff] }
 0x641   :  { %1764 = vmatpush1.bf16.msra.mxu0 %v1328_v53  ;;  %v1512_v53 = vld [vmem:[#allocation3 + $0x8e0] sm:$0xff] }
 0x642   :  { %1969 = vmatpush1.bf16.msra.mxu1 %v1488_v6  ;;  %1765 = vmatprep.subr.bf16.mxu0 %v1331_v54  ;;  %v1355_v6 = vld [vmem:[#allocation3 + $0x3f8] sm:$0xff] }
 0x643   :  { %1970 = vmatprep.subr.bf16.mxu1 %v1491_v21  ;;  %v1515_v54 = vld [vmem:[#allocation3 + $0x8f8] sm:$0xff]  ;;  %v1354_v21 = vld [vmem:[#allocation3 + $0x3f0] sm:$0xff] }
 0x645   :  { %1766 = vmatpush1.bf16.msra.mxu0 %v1330_v55  ;;  %v1514_v55 = vld [vmem:[#allocation3 + $0x8f0] sm:$0xff] }
 0x646   :  { %1971 = vmatpush1.bf16.msra.mxu1 %v1490_v57  ;;  %1767 = vmatprep.subr.bf16.mxu0 %v1333_v56  ;;  %v1357_v57 = vld [vmem:[#allocation3 + $0x408] sm:$0xff] }
 0x647   :  { %1972 = vmatprep.subr.bf16.mxu1 %v1493_v62  ;;  %v1517_v56 = vld [vmem:[#allocation3 + $0x908] sm:$0xff]  ;;  %v1356_v62 = vld [vmem:[#allocation3 + $0x400] sm:$0xff] }
 0x649   :  { %1768 = vmatpush1.bf16.msra.mxu0 %v1332_v52  ;;  %v1516_v52 = vld [vmem:[#allocation3 + $0x900] sm:$0xff] }
 0x64a   :  { %1973 = vmatpush1.bf16.msra.mxu1 %v1492_v28  ;;  %1769 = vmatprep.subr.bf16.mxu0 %v1335_v16  ;;  %v1359_v28 = vld [vmem:[#allocation3 + $0x418] sm:$0xff] }
 0x64b   :  { %1974 = vmatprep.subr.bf16.mxu1 %v1495_v31  ;;  %v1519_v16 = vld [vmem:[#allocation3 + $0x918] sm:$0xff]  ;;  %v1358_v31 = vld [vmem:[#allocation3 + $0x410] sm:$0xff] }
 0x64d   :  { %1770 = vmatpush1.bf16.msra.mxu0 %v1334_v58  ;;  %v1518_v58 = vld [vmem:[#allocation3 + $0x910] sm:$0xff] }
 0x64e   :  { %1975 = vmatpush1.bf16.msra.mxu1 %v1494_v61  ;;  %1771 = vmatprep.subr.bf16.mxu0 %v1337_v1  ;;  %v1361_v61 = vld [vmem:[#allocation3 + $0x428] sm:$0xff] }
 0x64f   :  { %1976 = vmatprep.subr.bf16.mxu1 %v1497_v7  ;;  %v1521_v1 = vld [vmem:[#allocation3 + $0x928] sm:$0xff]  ;;  %v1360_v7 = vld [vmem:[#allocation3 + $0x420] sm:$0xff] }
 0x651   :  { %1772 = vmatpush1.bf16.msra.mxu0 %v1336_v22  ;;  %v1363_v22 = vld [vmem:[#allocation3 + $0x438] sm:$0xff] }
 0x652   :  { %1977 = vmatpush1.bf16.msra.mxu1 %v1496_v59  ;;  %1773 = vmatprep.subr.bf16.mxu0 %v1339_v63  ;;  %v1362_v59 = vld [vmem:[#allocation3 + $0x430] sm:$0xff] }
 0x653   :  { %1978 = vmatprep.subr.bf16.mxu1 %v1499_v2  ;;  %v1522_v63 = vld [vmem:[#allocation3 + $0x930] sm:$0xff]  ;;  %v1365_v2 = vld [vmem:[#allocation3 + $0x448] sm:$0xff] }
 0x655   :  { %1774 = vmatpush1.bf16.msra.mxu0 %v1338_v3  ;;  %v1525_v3 = vld [vmem:[#allocation3 + $0x948] sm:$0xff] }
 0x656   :  { %1979 = vmatpush1.bf16.msra.mxu1 %v1498_v8  ;;  %1775 = vmatprep.subr.bf16.mxu0 %v1341_v9  ;;  %v1367_v8 = vld [vmem:[#allocation3 + $0x458] sm:$0xff] }
 0x657   :  { %1980 = vmatprep.subr.bf16.mxu1 %v1501_v10  ;;  %v1527_v9 = vld [vmem:[#allocation3 + $0x958] sm:$0xff]  ;;  %v1366_v10 = vld [vmem:[#allocation3 + $0x450] sm:$0xff] }
 0x659   :  { %1776 = vmatpush1.bf16.msra.mxu0 %v1340_v12  ;;  %v1526_v12 = vld [vmem:[#allocation3 + $0x950] sm:$0xff] }
 0x65a   :  { %1981 = vmatpush1.bf16.msra.mxu1 %v1500_v13  ;;  %1777 = vmatprep.subr.bf16.mxu0 %v1343_v14  ;;  %v1369_v13 = vld [vmem:[#allocation3 + $0x468] sm:$0xff] }
 0x65b   :  { %1982 = vmatprep.subr.bf16.mxu1 %v1503_v15  ;;  %v1529_v14 = vld [vmem:[#allocation3 + $0x968] sm:$0xff]  ;;  %v1368_v15 = vld [vmem:[#allocation3 + $0x460] sm:$0xff] }
 0x65d   :  { %1778 = vmatpush1.bf16.msra.mxu0 %v1342_v18  ;;  %v1528_v18 = vld [vmem:[#allocation3 + $0x960] sm:$0xff] }
 0x65e   :  { %1983 = vmatpush1.bf16.msra.mxu1 %v1502_v19  ;;  %1779 = vmatprep.subr.bf16.mxu0 %v1345_v60  ;;  %v1371_v19 = vld [vmem:[#allocation3 + $0x478] sm:$0xff] }
 0x65f   :  { %1984 = vmatprep.subr.bf16.mxu1 %v1505_v0  ;;  %v1531_v60 = vld [vmem:[#allocation3 + $0x978] sm:$0xff]  ;;  %v1370_v0 = vld [vmem:[#allocation3 + $0x470] sm:$0xff] }
 0x661   :  { %1780 = vmatpush1.bf16.msra.mxu0 %v1344_v20  ;;  %v1530_v20 = vld [vmem:[#allocation3 + $0x970] sm:$0xff] }
 0x662   :  { %1985 = vmatpush1.bf16.msra.mxu1 %v1504_v23  ;;  %1781 = vmatprep.subr.bf16.mxu0 %v1347_v24  ;;  %v1373_v23 = vld [vmem:[#allocation3 + $0x488] sm:$0xff] }
 0x663   :  { %1986 = vmatprep.subr.bf16.mxu1 %v1507_v25  ;;  %v1533_v24 = vld [vmem:[#allocation3 + $0x988] sm:$0xff]  ;;  %v1372_v25 = vld [vmem:[#allocation3 + $0x480] sm:$0xff] }
 0x665   :  { %1782 = vmatpush1.bf16.msra.mxu0 %v1346_v26  ;;  %v1532_v26 = vld [vmem:[#allocation3 + $0x980] sm:$0xff] }
 0x666   :  { %1987 = vmatpush1.bf16.msra.mxu1 %v1506_v33  ;;  %1783 = vmatprep.subr.bf16.mxu0 %v1349_v5  ;;  %v1375_v33 = vld [vmem:[#allocation3 + $0x498] sm:$0xff] }
 0x667   :  { %1988 = vmatprep.subr.bf16.mxu1 %v1509_v32  ;;  %v1535_v5 = vld [vmem:[#allocation3 + $0x998] sm:$0xff]  ;;  %v1374_v32 = vld [vmem:[#allocation3 + $0x490] sm:$0xff] }
 0x669   :  { %1784 = vmatpush1.bf16.msra.mxu0 %v1348_v34  ;;  %v1534_v34 = vld [vmem:[#allocation3 + $0x990] sm:$0xff] }
 0x66a   :  { %1989 = vmatpush1.bf16.msra.mxu1 %v1508_v35  ;;  %1785 = vmatprep.subr.bf16.mxu0 %v1351_v39  ;;  %v1377_v35 = vld [vmem:[#allocation3 + $0x4a8] sm:$0xff] }
 0x66b   :  { %1990 = vmatprep.subr.bf16.mxu1 %v1511_v40  ;;  %v1537_v39 = vld [vmem:[#allocation3 + $0x9a8] sm:$0xff]  ;;  %v1376_v40 = vld [vmem:[#allocation3 + $0x4a0] sm:$0xff] }
 0x66d   :  { %1786 = vmatpush1.bf16.msra.mxu0 %v1350_v41  ;;  %v1536_v41 = vld [vmem:[#allocation3 + $0x9a0] sm:$0xff] }
 0x66e   :  { %1991 = vmatpush1.bf16.msra.mxu1 %v1510_v44  ;;  %1787 = vmatprep.subr.bf16.mxu0 %v1353_v45  ;;  %v1379_v44 = vld [vmem:[#allocation3 + $0x4b8] sm:$0xff] }
 0x66f   :  { %1992 = vmatprep.subr.bf16.mxu1 %v1513_v49  ;;  %v1539_v45 = vld [vmem:[#allocation3 + $0x9b8] sm:$0xff]  ;;  %v1378_v49 = vld [vmem:[#allocation3 + $0x4b0] sm:$0xff] }
 0x671   :  { %1788 = vmatpush1.bf16.msra.mxu0 %v1352_v50  ;;  %v1538_v50 = vld [vmem:[#allocation3 + $0x9b0] sm:$0xff] }
 0x672   :  { %1993 = vmatpush1.bf16.msra.mxu1 %v1512_v53  ;;  %1789 = vmatprep.subr.bf16.mxu0 %v1355_v6  ;;  %v1381_v53 = vld [vmem:[#allocation3 + $0x4c8] sm:$0xff] }
 0x673   :  { %1994 = vmatprep.subr.bf16.mxu1 %v1515_v54  ;;  %v1541_v6 = vld [vmem:[#allocation3 + $0x9c8] sm:$0xff]  ;;  %v1380_v54 = vld [vmem:[#allocation3 + $0x4c0] sm:$0xff] }
 0x675   :  { %1790 = vmatpush1.bf16.msra.mxu0 %v1354_v21  ;;  %v1540_v21 = vld [vmem:[#allocation3 + $0x9c0] sm:$0xff] }
 0x676   :  { %1995 = vmatpush1.bf16.msra.mxu1 %v1514_v55  ;;  %1800 = vmatprep.subr.bf16.mxu0 %v1357_v57  ;;  %v1383_v55 = vld [vmem:[#allocation3 + $0x4d8] sm:$0xff] }
 0x677   :  { %2005 = vmatprep.subr.bf16.mxu1 %v1517_v56  ;;  %v1543_v57 = vld [vmem:[#allocation3 + $0x9d8] sm:$0xff]  ;;  %v1382_v56 = vld [vmem:[#allocation3 + $0x4d0] sm:$0xff] }
 0x678   :  { %1792 = vmatmul.mubr.bf16.vlgmr.msra.gmra.mrb[36].mxu0 %v3255_v11  ;;  %v1520_v11 = vld [vmem:[#allocation3 + $0x920] sm:$0xff] }
 0x679   :  { %1997 = vmatmul.mubr.bf16.vlgmr.msra.gmra.mrb[0].mxu1 %v3273_v29  ;;  %1801 = vmatpush1.bf16.msra.mxu0 %v1356_v62  ;;  %v1523_v29 = vld [vmem:[#allocation3 + $0x938] sm:$0xff]  ;;  %v1542_v62 = vld [vmem:[#allocation3 + $0x9d0] sm:$0xff] }
 0x67a   :  { %2006 = vmatpush1.bf16.msra.mxu1 %v1516_v52  ;;  %1802 = vmatprep.subr.bf16.mxu0 %v1359_v28  ;;  %v1385_v52 = vld [vmem:[#allocation3 + $0x4e8] sm:$0xff] }
 0x67b   :  { %2007 = vmatprep.subr.bf16.mxu1 %v1519_v16  ;;  %1832 = vmatprep.mubr.bf16.mxu0 %v3259_v17  ;;  %v1364_v17 = vld [vmem:[#allocation3 + $0x440] sm:$0xff]  ;;  %v1545_v28 = vld [vmem:[#allocation3 + $0x9e8] sm:$0xff] }
 0x67c   :  { %2037 = vmatprep.mubr.bf16.mxu1 %v3279_v37  ;;  %v1524_v37 = vld [vmem:[#allocation3 + $0x940] sm:$0xff] }
 0x67d   :  { %1803 = vmatpush1.bf16.msra.mxu0 %v1358_v31  ;;  %v1384_v16 = vld [vmem:[#allocation3 + $0x4e0] sm:$0xff] }
 0x67e   :  { %2008 = vmatpush1.bf16.msra.mxu1 %v1518_v58  ;;  %1804 = vmatprep.subr.bf16.mxu0 %v1361_v61  ;;  %v1544_v31 = vld [vmem:[#allocation3 + $0x9e0] sm:$0xff]  ;;  %v1387_v58 = vld [vmem:[#allocation3 + $0x4f8] sm:$0xff] }
 0x67f   :  { %2009 = vmatprep.subr.bf16.mxu1 %v1521_v1  ;;  %v1547_v61 = vld [vmem:[#allocation3 + $0x9f8] sm:$0xff]  ;;  %v1386_v1 = vld [vmem:[#allocation3 + $0x4f0] sm:$0xff] }
 0x681   :  { %1805 = vmatpush1.bf16.msra.mxu0 %v1360_v7  ;;  %v1546_v7 = vld [vmem:[#allocation3 + $0x9f0] sm:$0xff] }
 0x682   :  { %2010 = vmatpush1.bf16.msra.mxu1 %v1520_v11  ;;  %1806 = vmatprep.subr.bf16.mxu0 %v1363_v22  ;;  %v1549_v11 = vld [vmem:[#allocation3 + $0xa08] sm:$0xff]  ;;  %v1548_v22 = vld [vmem:[#allocation3 + $0xa00] sm:$0xff] }
 0x683   :  { %2011 = vmatprep.subr.bf16.mxu1 %v1523_v29  ;;  %v1551_v29 = vld [vmem:[#allocation3 + $0xa18] sm:$0xff] }
 0x685   :  { %1807 = vmatpush1.bf16.msra.mxu0 %v1362_v59  ;;  %v1550_v59 = vld [vmem:[#allocation3 + $0xa10] sm:$0xff] }
 0x686   :  { %2012 = vmatpush1.bf16.msra.mxu1 %v1522_v63  ;;  %1808 = vmatprep.subr.bf16.mxu0 %v1365_v2  ;;  %v1553_v63 = vld [vmem:[#allocation3 + $0xa28] sm:$0xff]  ;;  %v1552_v2 = vld [vmem:[#allocation3 + $0xa20] sm:$0xff] }
 0x687   :  { %2013 = vmatprep.subr.bf16.mxu1 %v1525_v3  ;;  %v1555_v3 = vld [vmem:[#allocation3 + $0xa38] sm:$0xff] }
 0x689   :  { %1809 = vmatpush1.bf16.msra.mxu0 %v1364_v17  ;;  %v1554_v17 = vld [vmem:[#allocation3 + $0xa30] sm:$0xff] }
 0x68a   :  { %2014 = vmatpush1.bf16.msra.mxu1 %v1524_v37  ;;  %1810 = vmatprep.subr.bf16.mxu0 %v1367_v8  ;;  %v1557_v37 = vld [vmem:[#allocation3 + $0xa48] sm:$0xff]  ;;  %v1556_v8 = vld [vmem:[#allocation3 + $0xa40] sm:$0xff] }
 0x68b   :  { %2015 = vmatprep.subr.bf16.mxu1 %v1527_v9  ;;  %v1561_v9 = vld [vmem:[#allocation3 + $0xa68] sm:$0xff] }
 0x68d   :  { %1811 = vmatpush1.bf16.msra.mxu0 %v1366_v10  ;;  %v1563_v10 = vld [vmem:[#allocation3 + $0xa78] sm:$0xff] }
 0x68e   :  { %2016 = vmatpush1.bf16.msra.mxu1 %v1526_v12  ;;  %1812 = vmatprep.subr.bf16.mxu0 %v1369_v13  ;;  %v1562_v12 = vld [vmem:[#allocation3 + $0xa70] sm:$0xff]  ;;  %v1565_v13 = vld [vmem:[#allocation3 + $0xa88] sm:$0xff] }
 0x68f   :  { %2017 = vmatprep.subr.bf16.mxu1 %v1529_v14  ;;  %v1564_v14 = vld [vmem:[#allocation3 + $0xa80] sm:$0xff] }
 0x691   :  { %1813 = vmatpush1.bf16.msra.mxu0 %v1368_v15  ;;  %v1567_v15 = vld [vmem:[#allocation3 + $0xa98] sm:$0xff] }
 0x692   :  { %2018 = vmatpush1.bf16.msra.mxu1 %v1528_v18  ;;  %1814 = vmatprep.subr.bf16.mxu0 %v1371_v19  ;;  %v1566_v18 = vld [vmem:[#allocation3 + $0xa90] sm:$0xff]  ;;  %v1569_v19 = vld [vmem:[#allocation3 + $0xaa8] sm:$0xff] }
 0x693   :  { %2019 = vmatprep.subr.bf16.mxu1 %v1531_v60  ;;  %v1568_v60 = vld [vmem:[#allocation3 + $0xaa0] sm:$0xff] }
 0x695   :  { %1815 = vmatpush1.bf16.msra.mxu0 %v1370_v0  ;;  %v1571_v0 = vld [vmem:[#allocation3 + $0xab8] sm:$0xff] }
 0x696   :  { %2020 = vmatpush1.bf16.msra.mxu1 %v1530_v20  ;;  %1816 = vmatprep.subr.bf16.mxu0 %v1373_v23  ;;  %v1570_v20 = vld [vmem:[#allocation3 + $0xab0] sm:$0xff]  ;;  %v1573_v23 = vld [vmem:[#allocation3 + $0xac8] sm:$0xff] }
 0x697   :  { %2021 = vmatprep.subr.bf16.mxu1 %v1533_v24  ;;  %v1572_v24 = vld [vmem:[#allocation3 + $0xac0] sm:$0xff] }
 0x699   :  { %1817 = vmatpush1.bf16.msra.mxu0 %v1372_v25  ;;  %v1575_v25 = vld [vmem:[#allocation3 + $0xad8] sm:$0xff] }
 0x69a   :  { %2022 = vmatpush1.bf16.msra.mxu1 %v1532_v26  ;;  %1818 = vmatprep.subr.bf16.mxu0 %v1375_v33  ;;  %v1574_v26 = vld [vmem:[#allocation3 + $0xad0] sm:$0xff]  ;;  %v1577_v33 = vld [vmem:[#allocation3 + $0xae8] sm:$0xff] }
 0x69b   :  { %2023 = vmatprep.subr.bf16.mxu1 %v1535_v5  ;;  %v1576_v5 = vld [vmem:[#allocation3 + $0xae0] sm:$0xff] }
 0x69d   :  { %1819 = vmatpush1.bf16.msra.mxu0 %v1374_v32  ;;  %v1579_v32 = vld [vmem:[#allocation3 + $0xaf8] sm:$0xff] }
 0x69e   :  { %2024 = vmatpush1.bf16.msra.mxu1 %v1534_v34  ;;  %1820 = vmatprep.subr.bf16.mxu0 %v1377_v35  ;;  %v1578_v34 = vld [vmem:[#allocation3 + $0xaf0] sm:$0xff]  ;;  %v1581_v35 = vld [vmem:[#allocation3 + $0xb08] sm:$0xff] }
 0x69f   :  { %2025 = vmatprep.subr.bf16.mxu1 %v1537_v39  ;;  %v1580_v39 = vld [vmem:[#allocation3 + $0xb00] sm:$0xff] }
 0x6a1   :  { %1821 = vmatpush1.bf16.msra.mxu0 %v1376_v40  ;;  %v1583_v40 = vld [vmem:[#allocation3 + $0xb18] sm:$0xff] }
 0x6a2   :  { %2026 = vmatpush1.bf16.msra.mxu1 %v1536_v41  ;;  %1822 = vmatprep.subr.bf16.mxu0 %v1379_v44  ;;  %v1582_v41 = vld [vmem:[#allocation3 + $0xb10] sm:$0xff]  ;;  %v1585_v44 = vld [vmem:[#allocation3 + $0xb28] sm:$0xff] }
 0x6a3   :  { %2027 = vmatprep.subr.bf16.mxu1 %v1539_v45  ;;  %v1584_v45 = vld [vmem:[#allocation3 + $0xb20] sm:$0xff] }
 0x6a5   :  { %1823 = vmatpush1.bf16.msra.mxu0 %v1378_v49  ;;  %v1587_v49 = vld [vmem:[#allocation3 + $0xb38] sm:$0xff] }
 0x6a6   :  { %2028 = vmatpush1.bf16.msra.mxu1 %v1538_v50  ;;  %1824 = vmatprep.subr.bf16.mxu0 %v1381_v53  ;;  %v1586_v50 = vld [vmem:[#allocation3 + $0xb30] sm:$0xff]  ;;  %v1589_v53 = vld [vmem:[#allocation3 + $0xb48] sm:$0xff] }
 0x6a7   :  { %2029 = vmatprep.subr.bf16.mxu1 %v1541_v6  ;;  %v1588_v6 = vld [vmem:[#allocation3 + $0xb40] sm:$0xff] }
 0x6a9   :  { %1825 = vmatpush1.bf16.msra.mxu0 %v1380_v54  ;;  %v1591_v54 = vld [vmem:[#allocation3 + $0xb58] sm:$0xff] }
 0x6aa   :  { %2030 = vmatpush1.bf16.msra.mxu1 %v1540_v21  ;;  %1826 = vmatprep.subr.bf16.mxu0 %v1383_v55  ;;  %v1593_v21 = vld [vmem:[#allocation3 + $0xb68] sm:$0xff]  ;;  %v2716_v55 = vld [vmem:[#allocation10 + $0x40] sm:$0xff]  }
 0x6ab   :  { %2031 = vmatprep.subr.bf16.mxu1 %v1543_v57  ;;  %v2717_v57 = vld [vmem:[#allocation10] sm:$0xff]  }
 0x6ad   :  { %1827 = vmatpush1.bf16.msra.mxu0 %v1382_v56  ;;  %v2718_v56 = vld [vmem:[#allocation10 + $0x48] sm:$0xff]  }
 0x6ae   :  { %2032 = vmatpush1.bf16.msra.mxu1 %v1542_v62  ;;  %1828 = vmatprep.subr.bf16.mxu0 %v1385_v52  ;;  %v1595_v62 = vld [vmem:[#allocation3 + $0xb78] sm:$0xff] }
 0x6af   :  { %2033 = vmatprep.subr.bf16.mxu1 %v1545_v28  ;;  %v2719_v52 = vld [vmem:[#allocation10 + $0x8] sm:$0xff]   ;;  %v1594_v28 = vld [vmem:[#allocation3 + $0xb70] sm:$0xff] }
 0x6b1   :  { %1829 = vmatpush1.bf16.msra.mxu0 %v1384_v16  ;;  %v2720_v16 = vld [vmem:[#allocation10 + $0x50] sm:$0xff]  }
 0x6b2   :  { %2034 = vmatpush1.bf16.msra.mxu1 %v1544_v31  ;;  %1830 = vmatprep.subr.bf16.mxu0 %v1387_v58  ;;  %v1597_v31 = vld [vmem:[#allocation3 + $0xb88] sm:$0xff] }
 0x6b3   :  { %2035 = vmatprep.subr.bf16.mxu1 %v1547_v61  ;;  %v2721_v58 = vld [vmem:[#allocation10 + $0x10] sm:$0xff]  }
 0x6b4   :  { %v1596_v61 = vld [vmem:[#allocation3 + $0xb80] sm:$0xff] }
 0x6b5   :  { %1831 = vmatpush1.bf16.msra.mxu0 %v1386_v1  ;;  %v2722_v1 = vld [vmem:[#allocation10 + $0x58] sm:$0xff]  }
 0x6b6   :  { %2036 = vmatpush1.bf16.msra.mxu1 %v1546_v7  ;;  %2489 = vmatprep.subr.bf16.mxu0 %v2716_v55  ;;  %v1599_v7 = vld [vmem:[#allocation3 + $0xb98] sm:$0xff]  ;;  %v2343_v55 = vand.u32 127, %v852_v27 }
 0x6b7   :  { %2046 = vmatprep.subr.bf16.mxu1 %v1549_v11  ;;  %v2723_v11 = vld [vmem:[#allocation10 + $0x18] sm:$0xff]  }
 0x6b8   :  { %1833 = vmatmul.mubr.bf16.vlgmr.msra.gmra.mrb[36].mxu0 %v3251_v30  ;;  %v1559_v30 = vld [vmem:[#allocation3 + $0xa58] sm:$0xff]  ;;  %vm2344_vm12 = vcmp.lt.s32.totalorder %v2343_v55, 121  ;;  %vm2358_vm14 = vcmp.eq.s32.totalorder %v2343_v55, 121 }
 0x6b9   :  { %2038 = vmatmul.mubr.bf16.vlgmr.msra.gmra.mrb[0].mxu1 %v3281_v38  ;;  %v1558_v38 = vld [vmem:[#allocation3 + $0xa50] sm:$0xff]  ;;  %2490 = vmatpush3.bf16.msra.mxu0 %v2717_v57 }
 0x6ba   :  { %2047 = vmatpush1.bf16.msra.mxu1 %v1548_v22  ;;  %2078 = vmatprep.mubr.bf16.mxu1 %v3285_v43  ;;  %v1560_v43 = vld [vmem:[#allocation3 + $0xa60] sm:$0xff]  ;;  %v1598_v22 = vld [vmem:[#allocation3 + $0xb90] sm:$0xff] }
 0x6bb   :  { %2048 = vmatprep.subr.bf16.mxu1 %v1551_v29  ;;  %2491 = vmatprep.subr.bf16.mxu0 %v2718_v56  ;;  %v2724_v29 = vld [vmem:[#allocation10 + $0x60] sm:$0xff]  }
 0x6bd   :  { %2492 = vmatpush3.bf16.msra.mxu0 %v2719_v52 }
 0x6be   :  { %2049 = vmatpush1.bf16.msra.mxu1 %v1550_v59  ;;  %2493 = vmatprep.subr.bf16.mxu0 %v2720_v16  ;;  %v1601_v59 = vld [vmem:[#allocation3 + $0xba8] sm:$0xff] }
 0x6bf   :  { %2050 = vmatprep.subr.bf16.mxu1 %v1553_v63  ;;  %v2725_v63 = vld [vmem:[#allocation10 + $0x20] sm:$0xff]  }
 0x6c1   :  { %2494 = vmatpush3.bf16.msra.mxu0 %v2721_v58 }
 0x6c2   :  { %2051 = vmatpush1.bf16.msra.mxu1 %v1552_v2  ;;  %2495 = vmatprep.subr.bf16.mxu0 %v2722_v1  ;;  %v1600_v2 = vld [vmem:[#allocation3 + $0xba0] sm:$0xff] }
 0x6c3   :  { %2052 = vmatprep.subr.bf16.mxu1 %v1555_v3  ;;  %v2726_v3 = vld [vmem:[#allocation10 + $0x68] sm:$0xff]  }
 0x6c5   :  { %2496 = vmatpush3.bf16.msra.mxu0 %v2723_v11 }
 0x6c6   :  { %2053 = vmatpush1.bf16.msra.mxu1 %v1554_v17  ;;  %2497 = vmatprep.subr.bf16.mxu0 %v2724_v29  ;;  %v1603_v17 = vld [vmem:[#allocation3 + $0xbb8] sm:$0xff] }
 0x6c7   :  { %2054 = vmatprep.subr.bf16.mxu1 %v1557_v37  ;;  %v2727_v37 = vld [vmem:[#allocation10 + $0x28] sm:$0xff]  }
 0x6c9   :  { %2498 = vmatpush3.bf16.msra.mxu0 %v2725_v63 }
 0x6ca   :  { %2055 = vmatpush1.bf16.msra.mxu1 %v1556_v8  ;;  %v1602_v8 = vld [vmem:[#allocation3 + $0xbb0] sm:$0xff]  ;;  %2499 = vmatprep.subr.bf16.mxu0 %v2726_v3 }
 0x6cb   :  { %2056 = vmatprep.subr.bf16.mxu1 %v1559_v30  ;;  %v1605_v30 = vld [vmem:[#allocation3 + $0xbc8] sm:$0xff] }
 0x6cd   :  { %2500 = vmatpush3.bf16.msra.mxu0 %v2727_v37 }
 0x6ce   :  { %2057 = vmatpush1.bf16.msra.mxu1 %v1558_v38  ;;  %v1604_v38 = vld [vmem:[#allocation3 + $0xbc0] sm:$0xff] }
 0x6cf   :  { %2058 = vmatprep.subr.bf16.mxu1 %v1561_v9  ;;  %v1607_v9 = vld [vmem:[#allocation3 + $0xbd8] sm:$0xff] }
 0x6d2   :  { %2059 = vmatpush1.bf16.msra.mxu1 %v1560_v43  ;;  %v1606_v43 = vld [vmem:[#allocation3 + $0xbd0] sm:$0xff] }
 0x6d3   :  { %2060 = vmatprep.subr.bf16.mxu1 %v1563_v10  ;;  %v1609_v10 = vld [vmem:[#allocation3 + $0xbe8] sm:$0xff] }
 0x6d6   :  { %2061 = vmatpush1.bf16.msra.mxu1 %v1562_v12  ;;  %v1608_v12 = vld [vmem:[#allocation3 + $0xbe0] sm:$0xff] }
 0x6d7   :  { %2062 = vmatprep.subr.bf16.mxu1 %v1565_v13  ;;  %v1611_v13 = vld [vmem:[#allocation3 + $0xbf8] sm:$0xff] }
 0x6da   :  { %2063 = vmatpush1.bf16.msra.mxu1 %v1564_v14  ;;  %v1610_v14 = vld [vmem:[#allocation3 + $0xbf0] sm:$0xff] }
 0x6db   :  { %2064 = vmatprep.subr.bf16.mxu1 %v1567_v15  ;;  %v1613_v15 = vld [vmem:[#allocation3 + $0xc08] sm:$0xff] }
 0x6de   :  { %2065 = vmatpush1.bf16.msra.mxu1 %v1566_v18  ;;  %v1612_v18 = vld [vmem:[#allocation3 + $0xc00] sm:$0xff] }
 0x6df   :  { %2066 = vmatprep.subr.bf16.mxu1 %v1569_v19  ;;  %v1615_v19 = vld [vmem:[#allocation3 + $0xc18] sm:$0xff] }
 0x6e2   :  { %2067 = vmatpush1.bf16.msra.mxu1 %v1568_v60  ;;  %v1614_v60 = vld [vmem:[#allocation3 + $0xc10] sm:$0xff] }
 0x6e3   :  { %2068 = vmatprep.subr.bf16.mxu1 %v1571_v0  ;;  %v1617_v0 = vld [vmem:[#allocation3 + $0xc28] sm:$0xff] }
 0x6e6   :  { %2069 = vmatpush1.bf16.msra.mxu1 %v1570_v20  ;;  %v1616_v20 = vld [vmem:[#allocation3 + $0xc20] sm:$0xff] }
 0x6e7   :  { %2070 = vmatprep.subr.bf16.mxu1 %v1573_v23  ;;  %v1619_v23 = vld [vmem:[#allocation3 + $0xc38] sm:$0xff] }
 0x6ea   :  { %2071 = vmatpush1.bf16.msra.mxu1 %v1572_v24  ;;  %v1618_v24 = vld [vmem:[#allocation3 + $0xc30] sm:$0xff] }
 0x6eb   :  { %2072 = vmatprep.subr.bf16.mxu1 %v1575_v25 }
 0x6ee   :  { %2073 = vmatpush1.bf16.msra.mxu1 %v1574_v26 }
 0x6ef   :  { %2074 = vmatprep.subr.bf16.mxu1 %v1577_v33 }
 0x6f2   :  { %2075 = vmatpush1.bf16.msra.mxu1 %v1576_v5  ;;  %v2728_v5 = vld [vmem:[#allocation10 + $0x70] sm:$0xff]  }
 0x6f3   :  { %2076 = vmatprep.subr.bf16.mxu1 %v1579_v32  ;;  %2501 = vmatprep.subr.bf16.mxu0 %v2728_v5  ;;  %v2730_v32 = vld [vmem:[#allocation10 + $0x78] sm:$0xff]  }
 0x6f6   :  { %2077 = vmatpush1.bf16.msra.mxu1 %v1578_v34  ;;  %v2731_v34 = vld [vmem:[#allocation10 + $0x38] sm:$0xff]  }
 0x6f7   :  { %2087 = vmatprep.subr.bf16.mxu1 %v1581_v35  ;;  %v1620_v35 = vld [vmem:[#allocation9] sm:$0x3] }
 0x6f9   :  { %2079 = vmatmul.mubr.bf16.vlgmr.msra.gmra.mrb[0].mxu1 %v3277_v36  ;;  %v1590_v36 = vld [vmem:[#allocation3 + $0xb50] sm:$0xff] }
 0x6fa   :  { %2088 = vmatpush1.bf16.msra.mxu1 %v1580_v39  ;;  %2119 = vmatprep.mubr.bf16.mxu1 %v3287_v46  ;;  %v1592_v46 = vld [vmem:[#allocation3 + $0xb60] sm:$0xff]  ;;  %v1625_v39 = vrot.slane %v1620_v35, %v3175_v48  ;;  %v2205_v48 = vld [vmem:[#allocation12] sm:$0x1] }
 0x6fb   :  { %2089 = vmatprep.subr.bf16.mxu1 %v1583_v40  ;;  %v1629_v40 = vrot.slane %v1620_v35, %v3177_v51 }
 0x6fe   :  { %2090 = vmatpush1.bf16.msra.mxu1 %v1582_v41 }
 0x6ff   :  { %2091 = vmatprep.subr.bf16.mxu1 %v1585_v44 }
 0x702   :  { %2092 = vmatpush1.bf16.msra.mxu1 %v1584_v45 }
 0x703   :  { %2093 = vmatprep.subr.bf16.mxu1 %v1587_v49 }
 0x706   :  { %2094 = vmatpush1.bf16.msra.mxu1 %v1586_v50 }
 0x707   :  { %2095 = vmatprep.subr.bf16.mxu1 %v1589_v53 }
 0x70a   :  { %2096 = vmatpush1.bf16.msra.mxu1 %v1588_v6 }
 0x70b   :  { %2097 = vmatprep.subr.bf16.mxu1 %v1591_v54 }
 0x70e   :  { %2098 = vmatpush1.bf16.msra.mxu1 %v1590_v36 }
 0x70f   :  { %2099 = vmatprep.subr.bf16.mxu1 %v1593_v21 }
 0x712   :  { %2100 = vmatpush1.bf16.msra.mxu1 %v1592_v46 }
 0x713   :  { %2101 = vmatprep.subr.bf16.mxu1 %v1595_v62 }
 0x716   :  { %2102 = vmatpush1.bf16.msra.mxu1 %v1594_v28 }
 0x717   :  { %2103 = vmatprep.subr.bf16.mxu1 %v1597_v31 }
 0x71a   :  { %2104 = vmatpush1.bf16.msra.mxu1 %v1596_v61 }
 0x71b   :  { %2105 = vmatprep.subr.bf16.mxu1 %v1599_v7 }
 0x71e   :  { %2106 = vmatpush1.bf16.msra.mxu1 %v1598_v22 }
 0x71f   :  { %2107 = vmatprep.subr.bf16.mxu1 %v1601_v59 }
 0x722   :  { %2108 = vmatpush1.bf16.msra.mxu1 %v1600_v2 }
 0x723   :  { %2109 = vmatprep.subr.bf16.mxu1 %v1603_v17 }
 0x726   :  { %2110 = vmatpush1.bf16.msra.mxu1 %v1602_v8 }
 0x727   :  { %2111 = vmatprep.subr.bf16.mxu1 %v1605_v30 }
 0x72a   :  { %2112 = vmatpush1.bf16.msra.mxu1 %v1604_v38 }
 0x72b   :  { %2113 = vmatprep.subr.bf16.mxu1 %v1607_v9 }
 0x72e   :  { %2114 = vmatpush1.bf16.msra.mxu1 %v1606_v43 }
 0x72f   :  { %2115 = vmatprep.subr.bf16.mxu1 %v1609_v10 }
 0x732   :  { %2116 = vmatpush1.bf16.msra.mxu1 %v1608_v12 }
 0x733   :  { %2117 = vmatprep.subr.bf16.mxu1 %v1611_v13 }
 0x736   :  { %2118 = vmatpush1.bf16.msra.mxu1 %v1610_v14 }
 0x737   :  { %2128 = vmatprep.subr.bf16.mxu1 %v1613_v15 }
 0x739   :  { %2120 = vmatmul.mubr.bf16.vlgmr.msra.gmra.mrb[0].mxu1 %v3283_v42 }
 0x73a   :  { %2129 = vmatpush1.bf16.msra.mxu1 %v1612_v18  ;;  %2160 = vmatprep.mubr.bf16.mxu1 %v2880_v4  ;;  %v2729_v4 = vld [vmem:[#allocation10 + $0x30] sm:$0xff]  }
 0x73b   :  { %2130 = vmatprep.subr.bf16.mxu1 %v1615_v19  ;;  %2502 = vmatpush3.bf16.msra.mxu0 %v2729_v4 }
 0x73c   :  { %2503 = vmatprep.subr.bf16.mxu0 %v2730_v32 }
 0x73e   :  { %2131 = vmatpush1.bf16.msra.mxu1 %v1614_v60 }
 0x73f   :  { %2132 = vmatprep.subr.bf16.mxu1 %v1617_v0  ;;  %2504 = vmatpush3.bf16.msra.mxu0 %v2731_v34 }
 0x742   :  { %2133 = vmatpush1.bf16.msra.mxu1 %v1616_v20 }
 0x743   :  { %2134 = vmatprep.subr.bf16.mxu1 %v1619_v23 }
 0x746   :  { %2135 = vmatpush1.bf16.msra.mxu1 %v1618_v24 }
 0x749   :  { %2406 = vmatmul.mubr.msk.bf16.vlgmr.msra.gmra.mrb[0].mxu1 %vm1632_vm11, %v3289_v47 }
 0x78b   :  { %v1834_v25 = vpop.f32.mrb[36].mxu0 }
 0x78c   :  { %v1836_v26 = vpop.f32.mrb[37].mxu0  ;;  %v2561_v41 = vadd.f32 %v1834_v25, %v1625_v39 }
 0x78d   :  { %v1838_v42 = vpop.f32.mrb[38].mxu0  ;;  %v2563_v44 = vadd.f32 %v1836_v26, %v1629_v40 }
 0x78e   :  { %v1839_v33 = vpop.f32.mrb[39].mxu0 }
 0x81c   :  { %v2162_v47 = vpop.f32.mrb[0].mxu1 }
 0x81d   :  { %v2562_v45 = vadd.f32 %v2561_v41, %v2162_v47  ;;  %v2164_v49 = vpop.f32.mrb[1].mxu1 }
 0x81e   :  { %v2564_v50 = vadd.f32 %v2563_v44, %v2164_v49  ;;  %v2166_v53 = vpop.f32.mrb[2].mxu1 }
 0x81f   :  { %v2169_v6 = vmax.f32 %v2562_v45, 0.0  ;;  %v2167_v54 = vpop.f32.mrb[3].mxu1 }
 0x820   :  { %v2170_v36 = vmax.f32 %v2564_v50, 0.0 }
 0x821   :  { %v2171_v46 = vpack.c.bf16 %v2169_v6, %v2169_v6 }
 0x822   :  { %v2172_v21 = vpack.c.bf16 %v2170_v36, %v2170_v36 }
 0x824   :  { %2334 = vmatprep.mubr.bf16.mxu0 %v2172_v21 }
 0x825   :  { %2335 = vmatmul.mubr.bf16.vlgmr.msra.gmra.mrb[40].mxu0 %v2171_v46 }
 0x8f8   :  { %v2505_v57 = vpop.f32.mrb[40].mxu0 }
 0x8f9   :  { %v2506_v56 = vpop.f32.mrb[41].mxu0 }
 0x8fa   :  { %v2507_v51 = vadd.f32 %v2506_v56, %v2505_v57  ;;  %v2508_v62 = vpop.f32.mrb[42].mxu0 }
 0x8fb   :  { %v2509_v52 = vpop.f32.mrb[43].mxu0 }
 0x8fc   :  { %v2337_v28 = vadd.f32 %v2507_v51, %v2205_v48 }
 0x8fe   :  { %2732 = vtanh.f32 %v2337_v28  ;;  %v2345_v16 = vsel %vm2344_vm12, %v2337_v28, -1e+30 }
 0x8ff   :  { %v2347_v31 = vsel %vm2346_vm13, %v2345_v16, -inf }
 0x900   :  { %2348 = vmax.xlane.f32.xlu0 %v2347_v31 }
 0x908   :  { %v2733_v58 = vpop.eup %2732 }
 0x909   :  { %v2360_v61 = vsel %vm2358_vm14, %v2733_v58, 0.0 }
 0x98d   :  { %v2349_v1 = vpop.xlane.xlu0 %2348 }
 0x98e   :  { %v2350_v7 = vsub.f32 %v2345_v16, %v2349_v1 }
 0x990   :  { %v2351_v11 = vmul.f32 1.442695, %v2350_v7 }
 0x992   :  { %2734 = vpow2.f32 %v2351_v11 }
 0x99c   :  { %v2735_v27 = vpop.eup %2734 }
 0x99d   :  { %v2353_v22 = vsel %vm2346_vm13, %v2735_v27, 0.0 }
 0x99e   :  { %2354 = vadd.xlane.f32.xlu0 %v2353_v22 }
 0xa2b   :  { %v2355_v29 = vpop.xlane.xlu0 %2354 }
 0xa2c   :  { %2736 = vrcp.f32 %v2355_v29 }
 0xa36   :  { %v2737_v59 = vpop.eup %2736 }
 0xa37   :  { %v2357_v63 = vmul.f32 %v2737_v59, %v2735_v27 }
 0xa39   :  { %v2361_v2 = vadd.f32 %v2360_v61, %v2357_v63 }
 0xa3b   :  { %2362 = vst [vmem:[%s3338_s10] sm:$0x1] %v2361_v2 }
 0xa3c   :  { %2367 = vsyncpa [#allocation6], 1 }
 0xa3d   :  { %2368 = vsyncpa [#allocation8], 1 }
 0xa3e   :  { %2369 = vsyncpa [#allocation11], 1 }
 0xa3f   :  { %2370 = vsyncmov [#allocation4] }
 0xa42   :  { %s2371_s6 = vpop.sfrf %2370 }
 0xa43   :  { %p2423_p12 = scmp.ne.s32.totalorder %s2371_s6, 0 }
 0xa45   :  { %2375 = shalt.err (%p2423_p12)  }

</bundles_post_ra>
